<compile_context>
chip_gen: v7x
topology: tpu7x:2x2x1
jax: 0.10.0
libtpu: 0.0.40
codegen_flags: <defaults>
</compile_context>

<pallas_src>
import functools

import jax
import jax.numpy as jnp
from jax.experimental import pallas as pl
from jax.experimental.pallas import tpu as pltpu


def _attention_kernel(x_ref, wqkv_ref, wo_ref, bo_ref, o_ref, *,
                      block_b, n_pad, n_valid, heads, dh_p):
    # x_ref:    (block_b*n_pad, D)      bf16  current batch tile, rows-flattened
    # wqkv_ref: (D, 3*H*dh_p)           bf16  fused [Q h0..hH-1 | K ... | V ...]
    #                                         (softmax scale folded into Q columns)
    # wo_ref:   (H*dh_p, D)             bf16  `to_out` weight (rows zero-padded per head)
    # bo_ref:   (1, D)                  f32   `to_out` Linear bias
    # o_ref:    (block_b*n_pad, D)            output tile
    rows = block_b * n_pad
    inner_p = heads * dh_p

    x2d = x_ref[...]                                              # bf16 (rows, D)

    # One fused Q/K/V projection on the MXU (bf16 operands, f32 accumulation).
    qkv = jnp.dot(x2d, wqkv_ref[...], preferred_element_type=jnp.float32)
    qkv = qkv.astype(jnp.bfloat16)                                # (rows, 3*H*dh_p)

    if n_valid < n_pad:
        key_idx = jax.lax.broadcasted_iota(jnp.int32, (1, 1, n_pad), 2)
        kmask = key_idx < n_valid                                 # mask padded keys
    else:
        kmask = None

    ctx_parts = []
    for h in range(heads):                                        # static, unrolled
        # 128-lane-aligned static slices of the fused projection.
        q = qkv[:, h * dh_p:(h + 1) * dh_p].reshape(block_b, n_pad, dh_p)
        k = qkv[:, inner_p + h * dh_p:inner_p + (h + 1) * dh_p].reshape(
            block_b, n_pad, dh_p)
        v = qkv[:, 2 * inner_p + h * dh_p:2 * inner_p + (h + 1) * dh_p].reshape(
            block_b, n_pad, dh_p)

        # Scaled dot-product attention; softmax kept in float32.
        s = jnp.einsum("bqd,bkd->bqk", q, k,
                       preferred_element_type=jnp.float32)        # (Bb, Np, Np)
        if kmask is not None:
            s = jnp.where(kmask, s, jnp.float32(-1e30))
        s = s - jnp.max(s, axis=-1, keepdims=True)
        e = jnp.exp(s)
        p = e * pl.reciprocal(jnp.sum(e, axis=-1, keepdims=True), approx=True)

        ctx = jnp.einsum("bqk,bkd->bqd", p.astype(jnp.bfloat16), v,
                         preferred_element_type=jnp.float32)      # (Bb, Np, dh_p)
        ctx_parts.append(ctx.astype(jnp.bfloat16).reshape(rows, dh_p))

    # Single wide output projection over all heads, then the Linear bias.
    ctx_all = jnp.concatenate(ctx_parts, axis=-1)                 # (rows, H*dh_p)
    y = jnp.dot(ctx_all, wo_ref[...], preferred_element_type=jnp.float32)
    o_ref[...] = (y + bo_ref[...]).astype(o_ref.dtype)


def _pick_block_b(batch, n_pad, target_rows=1024):
    """Largest divisor of `batch` with block_b*n_pad around target_rows, keeping at
    least 2 batch blocks when batch > 1 so both v7x TensorCores get work."""
    cap = max(1, target_rows // n_pad)
    if batch > 1:
        cap = min(cap, batch // 2)
    cap = max(cap, 1)
    best = 1
    for cand in range(1, min(batch, cap) + 1):
        if batch % cand == 0:
            best = cand
    return best


def attention_pallas(x, w_qkv_t, w_out_t, b_out, *, heads, dim_head, block_b=None):
    """x: (B, N, D) f32.  w_qkv_t: (D, 3*H*Dh) (to_qkv, transposed, bias=False).
    w_out_t: (H*Dh, D), b_out: (D,)  — the `to_out` Linear (bias=True).  Eval mode."""
    B, N, D = x.shape
    inner = heads * dim_head
    assert w_qkv_t.shape == (D, 3 * inner)
    assert w_out_t.shape == (inner, D)
    out_dtype = x.dtype
    scale = dim_head ** (-0.5)

    dh_p = ((dim_head + 127) // 128) * 128      # lane-aligned per-head width
    n_pad = ((N + 7) // 8) * 8                  # sublane-aligned sequence length

    # ---- wrapper-side relayout (done once, cheap) ----
    wq, wk, wv = jnp.split(w_qkv_t, 3, axis=-1)                   # (D, inner) each

    def head_pad(w, col_scale=1.0):                               # (D, inner) -> (D, H*dh_p)
        w = w.reshape(D, heads, dim_head) * col_scale
        if dh_p != dim_head:
            w = jnp.pad(w, ((0, 0), (0, 0), (0, dh_p - dim_head)))
        return w.reshape(D, heads * dh_p)

    # Fold the softmax scale into the Q projection weights (free).
    w_fused = jnp.concatenate(
        [head_pad(wq, scale), head_pad(wk), head_pad(wv)], axis=-1)  # (D, 3*H*dh_p)

    wo = w_out_t.reshape(heads, dim_head, D)
    if dh_p != dim_head:
        wo = jnp.pad(wo, ((0, 0), (0, dh_p - dim_head), (0, 0)))
    wo = wo.reshape(heads * dh_p, D)                              # (H*dh_p, D)

    if n_pad != N:
        x = jnp.pad(x, ((0, 0), (0, n_pad - N), (0, 0)))
    x2d = x.reshape(B * n_pad, D).astype(jnp.bfloat16)            # 2-D slab, no in-kernel relayout

    w_fused = w_fused.astype(jnp.bfloat16)
    wo = wo.astype(jnp.bfloat16)
    bo = b_out.reshape(1, D).astype(jnp.float32)

    if block_b is None:
        block_b = _pick_block_b(B, n_pad)
    assert B % block_b == 0
    rows_blk = block_b * n_pad

    kernel = functools.partial(_attention_kernel, block_b=block_b, n_pad=n_pad,
                               n_valid=N, heads=heads, dh_p=dh_p)

    out2d = pl.pallas_call(
        kernel,
        out_shape=jax.ShapeDtypeStruct((B * n_pad, D), out_dtype),
        grid_spec=pltpu.PrefetchScalarGridSpec(
            num_scalar_prefetch=0,
            grid=(B // block_b,),                  # single batch-tile axis
            in_specs=[
                pl.BlockSpec((rows_blk, D), lambda b: (b, 0)),
                # Weights: constant index_maps -> DMA'd once, resident for the call.
                pl.BlockSpec((D, 3 * heads * dh_p), lambda b: (0, 0)),
                pl.BlockSpec((heads * dh_p, D), lambda b: (0, 0)),
                pl.BlockSpec((1, D), lambda b: (0, 0)),
            ],
            out_specs=pl.BlockSpec((rows_blk, D), lambda b: (b, 0)),
        ),
        compiler_params=pltpu.CompilerParams(
            dimension_semantics=("parallel",),
            vmem_limit_bytes=64 * 1024 * 1024,
        ),
    )(x2d, w_fused, wo, bo)

    return out2d.reshape(B, n_pad, D)[:, :N, :]


def attention_reference(x, w_qkv_t, w_out_t, b_out, *, heads, dim_head):
    """Pure-JAX f32 reference matching the PyTorch forward (to_out bias included)."""
    B, N, D = x.shape
    scale = dim_head ** (-0.5)
    qkv = x @ w_qkv_t                                   # (B, N, 3*inner)
    q, k, v = jnp.split(qkv, 3, axis=-1)

    def to_heads(t):                                    # 'b n (h d) -> b h n d'
        return t.reshape(B, N, heads, dim_head).transpose(0, 2, 1, 3)

    q, k, v = map(to_heads, (q, k, v))
    dots = jnp.einsum("bhnd,bhmd->bhnm", q, k) * scale
    attn = jax.nn.softmax(dots, axis=-1)
    out = jnp.einsum("bhnm,bhmd->bhnd", attn, v)
    out = out.transpose(0, 2, 1, 3).reshape(B, N, heads * dim_head)
    return out @ w_out_t + b_out


if __name__ == "__main__":
    # Small shapes consistent with the module's Attention block:
    # N = (224/32)^2 = 49 patches; small dim/heads for a quick test.
    B, N, dim = 2, 49, 32
    heads, dim_head = 4, 8
    inner = heads * dim_head

    key = jax.random.PRNGKey(0)
    k_x, k_wqkv, k_wout, k_bout = jax.random.split(key, 4)

    x = jax.random.normal(k_x, (B, N, dim), dtype=jnp.float32)
    # PyTorch stores Linear weights as (out, in); we keep the transposed (in, out) layout.
    w_qkv_t = jax.random.normal(k_wqkv, (dim, 3 * inner), dtype=jnp.float32) * (dim ** -0.5)
    w_out_t = jax.random.normal(k_wout, (inner, dim), dtype=jnp.float32) * (inner ** -0.5)
    b_out = jax.random.normal(k_bout, (dim,), dtype=jnp.float32) * (inner ** -0.5)

    out = attention_pallas(x, w_qkv_t, w_out_t, b_out, heads=heads, dim_head=dim_head)
    out = jax.block_until_ready(out)

    ref = attention_reference(x, w_qkv_t, w_out_t, b_out, heads=heads, dim_head=dim_head)
    assert out.shape == (B, N, dim)
    # bf16 MXU operands + approx reciprocal => loosened tolerances vs the f32 reference.
    assert jnp.allclose(out, ref, atol=1e-1, rtol=5e-2), (
        f"Pallas output mismatch vs reference; max abs err = {jnp.max(jnp.abs(out - ref))}"
    )

    print("KERNEL_OK")
</pallas_src>

<mosaic_0001>
module attributes {stable_mosaic.version = 11 : i64} {
  func.func @_attention_kernel(%arg0: i32, %arg1: memref<56x32xbf16, #tpu.memory_space<vmem>>, %arg2: memref<32x1536xbf16, #tpu.memory_space<vmem>>, %arg3: memref<512x32xbf16, #tpu.memory_space<vmem>>, %arg4: memref<1x32xf32, #tpu.memory_space<vmem>>, %arg5: memref<56x32xf32, #tpu.memory_space<vmem>>) attributes {dimension_semantics = [#tpu.dimension_semantics<parallel>], iteration_bounds = array<i64: 2>, scalar_prefetch = 0 : i64, scratch_operands = 0 : i64, tpu.core_type = #tpu.core_type<tc>, window_params = [{transform_indices = @transform_0, window_bounds = array<i64: 56, 32>}, {pipeline_mode = #tpu.pipeline_mode<synchronous>, transform_indices = @transform_1, window_bounds = array<i64: 32, 1536>}, {pipeline_mode = #tpu.pipeline_mode<synchronous>, transform_indices = @transform_2, window_bounds = array<i64: 512, 32>}, {pipeline_mode = #tpu.pipeline_mode<synchronous>, transform_indices = @transform_3, window_bounds = array<i64: 1, 32>}, {transform_indices = @transform_4, window_bounds = array<i64: 56, 32>}]} {
    %c0 = arith.constant 0 : index
    %c0_0 = arith.constant 0 : index
    %0 = vector.load %arg1[%c0, %c0_0] : memref<56x32xbf16, #tpu.memory_space<vmem>>, vector<56x32xbf16>
    %c0_1 = arith.constant 0 : index
    %c0_2 = arith.constant 0 : index
    %1 = vector.load %arg2[%c0_1, %c0_2] : memref<32x1536xbf16, #tpu.memory_space<vmem>>, vector<32x1536xbf16>
    %cst = arith.constant dense<0.000000e+00> : vector<56x1536xf32>
    %2 = tpu.matmul %0, %1, %cst {dimension_numbers = #tpu.dot_dimension_numbers<[1], [0], [0], [1], [0, 0, 1, 1], [], []>} : vector<56x32xbf16>, vector<32x1536xbf16>, vector<56x1536xf32> -> vector<56x1536xf32>
    %3 = arith.truncf %2 : vector<56x1536xf32> to vector<56x1536xbf16>
    %4 = tpu.iota {dimensions = array<i32: 2>} : vector<1x1x56xi32>
    %c49_i32 = arith.constant 49 : i32
    %5 = vector.broadcast %c49_i32 : i32 to vector<1x1x56xi32>
    %6 = arith.cmpi slt, %4, %5 : vector<1x1x56xi32>
    %7 = vector.extract_strided_slice %3 {offsets = [0, 0], sizes = [56, 128], strides = [1, 1]} : vector<56x1536xbf16> to vector<56x128xbf16>
    %8 = vector.shape_cast %7 : vector<56x128xbf16> to vector<1x56x128xbf16>
    %9 = vector.extract_strided_slice %3 {offsets = [0, 512], sizes = [56, 128], strides = [1, 1]} : vector<56x1536xbf16> to vector<56x128xbf16>
    %10 = vector.shape_cast %9 : vector<56x128xbf16> to vector<1x56x128xbf16>
    %11 = vector.extract_strided_slice %3 {offsets = [0, 1024], sizes = [56, 128], strides = [1, 1]} : vector<56x1536xbf16> to vector<56x128xbf16>
    %12 = vector.shape_cast %11 : vector<56x128xbf16> to vector<1x56x128xbf16>
    "tpu.trace_start"() <{level = 10 : i32, message = "bqd,bkd->bqk"}> : () -> ()
    %cst_3 = arith.constant dense<0.000000e+00> : vector<1x56x56xf32>
    %13 = tpu.matmul %8, %10, %cst_3 {dimension_numbers = #tpu.dot_dimension_numbers<[2], [2], [1], [1], [0, 0, 0, 1, 1, 1], [0], [0]>} : vector<1x56x128xbf16>, vector<1x56x128xbf16>, vector<1x56x56xf32> -> vector<1x56x56xf32>
    %cst_4 = arith.constant -1.000000e+30 : f32
    "tpu.trace_stop"() : () -> ()
    %14 = vector.shape_cast %6 : vector<1x1x56xi1> to vector<1x1x56xi1>
    %15 = vector.broadcast %14 : vector<1x1x56xi1> to vector<1x56x56xi1>
    %16 = vector.broadcast %cst_4 : f32 to vector<1x56x56xf32>
    %17 = arith.select %15, %13, %16 : vector<1x56x56xi1>, vector<1x56x56xf32>
    %cst_5 = arith.constant dense<0xFF800000> : vector<1x56xf32>
    %18 = vector.multi_reduction <maximumf>, %17, %cst_5 [2] : vector<1x56x56xf32> to vector<1x56xf32>
    %19 = vector.shape_cast %18 : vector<1x56xf32> to vector<1x56x1xf32>
    %20 = vector.broadcast %19 : vector<1x56x1xf32> to vector<1x56x56xf32>
    %21 = arith.subf %17, %20 : vector<1x56x56xf32>
    %22 = math.exp %21 : vector<1x56x56xf32>
    %cst_6 = arith.constant dense<0.000000e+00> : vector<1x56xf32>
    %23 = vector.multi_reduction <add>, %22, %cst_6 [2] : vector<1x56x56xf32> to vector<1x56xf32>
    %24 = vector.shape_cast %23 : vector<1x56xf32> to vector<1x56x1xf32>
    %25 = tpu.reciprocal %24 {approx = true} : vector<1x56x1xf32> -> vector<1x56x1xf32>
    %26 = vector.broadcast %25 : vector<1x56x1xf32> to vector<1x56x56xf32>
    %27 = arith.mulf %22, %26 : vector<1x56x56xf32>
    %28 = arith.truncf %27 : vector<1x56x56xf32> to vector<1x56x56xbf16>
    "tpu.trace_start"() <{level = 10 : i32, message = "bqk,bkd->bqd"}> : () -> ()
    %cst_7 = arith.constant dense<0.000000e+00> : vector<1x56x128xf32>
    %29 = tpu.matmul %28, %12, %cst_7 {dimension_numbers = #tpu.dot_dimension_numbers<[2], [1], [1], [2], [0, 0, 0, 1, 1, 2], [0], [0]>} : vector<1x56x56xbf16>, vector<1x56x128xbf16>, vector<1x56x128xf32> -> vector<1x56x128xf32>
    "tpu.trace_stop"() : () -> ()
    %30 = arith.truncf %29 : vector<1x56x128xf32> to vector<1x56x128xbf16>
    %31 = vector.shape_cast %30 : vector<1x56x128xbf16> to vector<56x128xbf16>
    %32 = vector.extract_strided_slice %3 {offsets = [0, 128], sizes = [56, 128], strides = [1, 1]} : vector<56x1536xbf16> to vector<56x128xbf16>
    %33 = vector.shape_cast %32 : vector<56x128xbf16> to vector<1x56x128xbf16>
    %34 = vector.extract_strided_slice %3 {offsets = [0, 640], sizes = [56, 128], strides = [1, 1]} : vector<56x1536xbf16> to vector<56x128xbf16>
    %35 = vector.shape_cast %34 : vector<56x128xbf16> to vector<1x56x128xbf16>
    %36 = vector.extract_strided_slice %3 {offsets = [0, 1152], sizes = [56, 128], strides = [1, 1]} : vector<56x1536xbf16> to vector<56x128xbf16>
    %37 = vector.shape_cast %36 : vector<56x128xbf16> to vector<1x56x128xbf16>
    "tpu.trace_start"() <{level = 10 : i32, message = "bqd,bkd->bqk"}> : () -> ()
    %cst_8 = arith.constant dense<0.000000e+00> : vector<1x56x56xf32>
    %38 = tpu.matmul %33, %35, %cst_8 {dimension_numbers = #tpu.dot_dimension_numbers<[2], [2], [1], [1], [0, 0, 0, 1, 1, 1], [0], [0]>} : vector<1x56x128xbf16>, vector<1x56x128xbf16>, vector<1x56x56xf32> -> vector<1x56x56xf32>
    %cst_9 = arith.constant -1.000000e+30 : f32
    "tpu.trace_stop"() : () -> ()
    %39 = vector.shape_cast %6 : vector<1x1x56xi1> to vector<1x1x56xi1>
    %40 = vector.broadcast %39 : vector<1x1x56xi1> to vector<1x56x56xi1>
    %41 = vector.broadcast %cst_9 : f32 to vector<1x56x56xf32>
    %42 = arith.select %40, %38, %41 : vector<1x56x56xi1>, vector<1x56x56xf32>
    %cst_10 = arith.constant dense<0xFF800000> : vector<1x56xf32>
    %43 = vector.multi_reduction <maximumf>, %42, %cst_10 [2] : vector<1x56x56xf32> to vector<1x56xf32>
    %44 = vector.shape_cast %43 : vector<1x56xf32> to vector<1x56x1xf32>
    %45 = vector.broadcast %44 : vector<1x56x1xf32> to vector<1x56x56xf32>
    %46 = arith.subf %42, %45 : vector<1x56x56xf32>
    %47 = math.exp %46 : vector<1x56x56xf32>
    %cst_11 = arith.constant dense<0.000000e+00> : vector<1x56xf32>
    %48 = vector.multi_reduction <add>, %47, %cst_11 [2] : vector<1x56x56xf32> to vector<1x56xf32>
    %49 = vector.shape_cast %48 : vector<1x56xf32> to vector<1x56x1xf32>
    %50 = tpu.reciprocal %49 {approx = true} : vector<1x56x1xf32> -> vector<1x56x1xf32>
    %51 = vector.broadcast %50 : vector<1x56x1xf32> to vector<1x56x56xf32>
    %52 = arith.mulf %47, %51 : vector<1x56x56xf32>
    %53 = arith.truncf %52 : vector<1x56x56xf32> to vector<1x56x56xbf16>
    "tpu.trace_start"() <{level = 10 : i32, message = "bqk,bkd->bqd"}> : () -> ()
    %cst_12 = arith.constant dense<0.000000e+00> : vector<1x56x128xf32>
    %54 = tpu.matmul %53, %37, %cst_12 {dimension_numbers = #tpu.dot_dimension_numbers<[2], [1], [1], [2], [0, 0, 0, 1, 1, 2], [0], [0]>} : vector<1x56x56xbf16>, vector<1x56x128xbf16>, vector<1x56x128xf32> -> vector<1x56x128xf32>
    "tpu.trace_stop"() : () -> ()
    %55 = arith.truncf %54 : vector<1x56x128xf32> to vector<1x56x128xbf16>
    %56 = vector.shape_cast %55 : vector<1x56x128xbf16> to vector<56x128xbf16>
    %57 = vector.extract_strided_slice %3 {offsets = [0, 256], sizes = [56, 128], strides = [1, 1]} : vector<56x1536xbf16> to vector<56x128xbf16>
    %58 = vector.shape_cast %57 : vector<56x128xbf16> to vector<1x56x128xbf16>
    %59 = vector.extract_strided_slice %3 {offsets = [0, 768], sizes = [56, 128], strides = [1, 1]} : vector<56x1536xbf16> to vector<56x128xbf16>
    %60 = vector.shape_cast %59 : vector<56x128xbf16> to vector<1x56x128xbf16>
    %61 = vector.extract_strided_slice %3 {offsets = [0, 1280], sizes = [56, 128], strides = [1, 1]} : vector<56x1536xbf16> to vector<56x128xbf16>
    %62 = vector.shape_cast %61 : vector<56x128xbf16> to vector<1x56x128xbf16>
    "tpu.trace_start"() <{level = 10 : i32, message = "bqd,bkd->bqk"}> : () -> ()
    %cst_13 = arith.constant dense<0.000000e+00> : vector<1x56x56xf32>
    %63 = tpu.matmul %58, %60, %cst_13 {dimension_numbers = #tpu.dot_dimension_numbers<[2], [2], [1], [1], [0, 0, 0, 1, 1, 1], [0], [0]>} : vector<1x56x128xbf16>, vector<1x56x128xbf16>, vector<1x56x56xf32> -> vector<1x56x56xf32>
    %cst_14 = arith.constant -1.000000e+30 : f32
    "tpu.trace_stop"() : () -> ()
    %64 = vector.shape_cast %6 : vector<1x1x56xi1> to vector<1x1x56xi1>
    %65 = vector.broadcast %64 : vector<1x1x56xi1> to vector<1x56x56xi1>
    %66 = vector.broadcast %cst_14 : f32 to vector<1x56x56xf32>
    %67 = arith.select %65, %63, %66 : vector<1x56x56xi1>, vector<1x56x56xf32>
    %cst_15 = arith.constant dense<0xFF800000> : vector<1x56xf32>
    %68 = vector.multi_reduction <maximumf>, %67, %cst_15 [2] : vector<1x56x56xf32> to vector<1x56xf32>
    %69 = vector.shape_cast %68 : vector<1x56xf32> to vector<1x56x1xf32>
    %70 = vector.broadcast %69 : vector<1x56x1xf32> to vector<1x56x56xf32>
    %71 = arith.subf %67, %70 : vector<1x56x56xf32>
    %72 = math.exp %71 : vector<1x56x56xf32>
    %cst_16 = arith.constant dense<0.000000e+00> : vector<1x56xf32>
    %73 = vector.multi_reduction <add>, %72, %cst_16 [2] : vector<1x56x56xf32> to vector<1x56xf32>
    %74 = vector.shape_cast %73 : vector<1x56xf32> to vector<1x56x1xf32>
    %75 = tpu.reciprocal %74 {approx = true} : vector<1x56x1xf32> -> vector<1x56x1xf32>
    %76 = vector.broadcast %75 : vector<1x56x1xf32> to vector<1x56x56xf32>
    %77 = arith.mulf %72, %76 : vector<1x56x56xf32>
    %78 = arith.truncf %77 : vector<1x56x56xf32> to vector<1x56x56xbf16>
    "tpu.trace_start"() <{level = 10 : i32, message = "bqk,bkd->bqd"}> : () -> ()
    %cst_17 = arith.constant dense<0.000000e+00> : vector<1x56x128xf32>
    %79 = tpu.matmul %78, %62, %cst_17 {dimension_numbers = #tpu.dot_dimension_numbers<[2], [1], [1], [2], [0, 0, 0, 1, 1, 2], [0], [0]>} : vector<1x56x56xbf16>, vector<1x56x128xbf16>, vector<1x56x128xf32> -> vector<1x56x128xf32>
    "tpu.trace_stop"() : () -> ()
    %80 = arith.truncf %79 : vector<1x56x128xf32> to vector<1x56x128xbf16>
    %81 = vector.shape_cast %80 : vector<1x56x128xbf16> to vector<56x128xbf16>
    %82 = vector.extract_strided_slice %3 {offsets = [0, 384], sizes = [56, 128], strides = [1, 1]} : vector<56x1536xbf16> to vector<56x128xbf16>
    %83 = vector.shape_cast %82 : vector<56x128xbf16> to vector<1x56x128xbf16>
    %84 = vector.extract_strided_slice %3 {offsets = [0, 896], sizes = [56, 128], strides = [1, 1]} : vector<56x1536xbf16> to vector<56x128xbf16>
    %85 = vector.shape_cast %84 : vector<56x128xbf16> to vector<1x56x128xbf16>
    %86 = vector.extract_strided_slice %3 {offsets = [0, 1408], sizes = [56, 128], strides = [1, 1]} : vector<56x1536xbf16> to vector<56x128xbf16>
    %87 = vector.shape_cast %86 : vector<56x128xbf16> to vector<1x56x128xbf16>
    "tpu.trace_start"() <{level = 10 : i32, message = "bqd,bkd->bqk"}> : () -> ()
    %cst_18 = arith.constant dense<0.000000e+00> : vector<1x56x56xf32>
    %88 = tpu.matmul %83, %85, %cst_18 {dimension_numbers = #tpu.dot_dimension_numbers<[2], [2], [1], [1], [0, 0, 0, 1, 1, 1], [0], [0]>} : vector<1x56x128xbf16>, vector<1x56x128xbf16>, vector<1x56x56xf32> -> vector<1x56x56xf32>
    %cst_19 = arith.constant -1.000000e+30 : f32
    "tpu.trace_stop"() : () -> ()
    %89 = vector.shape_cast %6 : vector<1x1x56xi1> to vector<1x1x56xi1>
    %90 = vector.broadcast %89 : vector<1x1x56xi1> to vector<1x56x56xi1>
    %91 = vector.broadcast %cst_19 : f32 to vector<1x56x56xf32>
    %92 = arith.select %90, %88, %91 : vector<1x56x56xi1>, vector<1x56x56xf32>
    %cst_20 = arith.constant dense<0xFF800000> : vector<1x56xf32>
    %93 = vector.multi_reduction <maximumf>, %92, %cst_20 [2] : vector<1x56x56xf32> to vector<1x56xf32>
    %94 = vector.shape_cast %93 : vector<1x56xf32> to vector<1x56x1xf32>
    %95 = vector.broadcast %94 : vector<1x56x1xf32> to vector<1x56x56xf32>
    %96 = arith.subf %92, %95 : vector<1x56x56xf32>
    %97 = math.exp %96 : vector<1x56x56xf32>
    %cst_21 = arith.constant dense<0.000000e+00> : vector<1x56xf32>
    %98 = vector.multi_reduction <add>, %97, %cst_21 [2] : vector<1x56x56xf32> to vector<1x56xf32>
    %99 = vector.shape_cast %98 : vector<1x56xf32> to vector<1x56x1xf32>
    %100 = tpu.reciprocal %99 {approx = true} : vector<1x56x1xf32> -> vector<1x56x1xf32>
    %101 = vector.broadcast %100 : vector<1x56x1xf32> to vector<1x56x56xf32>
    %102 = arith.mulf %97, %101 : vector<1x56x56xf32>
    %103 = arith.truncf %102 : vector<1x56x56xf32> to vector<1x56x56xbf16>
    "tpu.trace_start"() <{level = 10 : i32, message = "bqk,bkd->bqd"}> : () -> ()
    %cst_22 = arith.constant dense<0.000000e+00> : vector<1x56x128xf32>
    %104 = tpu.matmul %103, %87, %cst_22 {dimension_numbers = #tpu.dot_dimension_numbers<[2], [1], [1], [2], [0, 0, 0, 1, 1, 2], [0], [0]>} : vector<1x56x56xbf16>, vector<1x56x128xbf16>, vector<1x56x128xf32> -> vector<1x56x128xf32>
    "tpu.trace_stop"() : () -> ()
    %105 = arith.truncf %104 : vector<1x56x128xf32> to vector<1x56x128xbf16>
    %106 = vector.shape_cast %105 : vector<1x56x128xbf16> to vector<56x128xbf16>
    %107 = tpu.concatenate %31, %56, %81, %106 in 1 : vector<56x128xbf16>, vector<56x128xbf16>, vector<56x128xbf16>, vector<56x128xbf16> -> vector<56x512xbf16>
    %c0_23 = arith.constant 0 : index
    %c0_24 = arith.constant 0 : index
    %108 = vector.load %arg3[%c0_23, %c0_24] : memref<512x32xbf16, #tpu.memory_space<vmem>>, vector<512x32xbf16>
    %cst_25 = arith.constant dense<0.000000e+00> : vector<56x32xf32>
    %109 = tpu.matmul %107, %108, %cst_25 {dimension_numbers = #tpu.dot_dimension_numbers<[1], [0], [0], [1], [0, 0, 1, 1], [], []>} : vector<56x512xbf16>, vector<512x32xbf16>, vector<56x32xf32> -> vector<56x32xf32>
    %c0_26 = arith.constant 0 : index
    %c0_27 = arith.constant 0 : index
    %110 = vector.load %arg4[%c0_26, %c0_27] : memref<1x32xf32, #tpu.memory_space<vmem>>, vector<1x32xf32>
    %111 = vector.broadcast %110 : vector<1x32xf32> to vector<56x32xf32>
    %112 = arith.addf %109, %111 : vector<56x32xf32>
    %c0_28 = arith.constant 0 : index
    %c0_29 = arith.constant 0 : index
    %113 = vector.load %arg5[%c0_28, %c0_29] : memref<56x32xf32, #tpu.memory_space<vmem>>, vector<56x32xf32>
    tpu.vector_store %arg5[%c0_28, %c0_29], %112 {strides = array<i32>} : memref<56x32xf32, #tpu.memory_space<vmem>>, vector<56x32xf32>,
    return
  }
  func.func @transform_0(%arg0: i32) -> (i32, i32) {
    %c0_i32 = arith.constant 0 : i32
    %c0_i32_0 = arith.constant 0 : i32
    return %arg0, %c0_i32 : i32, i32
  }
  func.func @transform_1(%arg0: i32) -> (i32, i32) {
    %c0_i32 = arith.constant 0 : i32
    %c0_i32_0 = arith.constant 0 : i32
    %c0_i32_1 = arith.constant 0 : i32
    return %c0_i32, %c0_i32_0 : i32, i32
  }
  func.func @transform_2(%arg0: i32) -> (i32, i32) {
    %c0_i32 = arith.constant 0 : i32
    %c0_i32_0 = arith.constant 0 : i32
    %c0_i32_1 = arith.constant 0 : i32
    return %c0_i32, %c0_i32_0 : i32, i32
  }
  func.func @transform_3(%arg0: i32) -> (i32, i32) {
    %c0_i32 = arith.constant 0 : i32
    %c0_i32_0 = arith.constant 0 : i32
    %c0_i32_1 = arith.constant 0 : i32
    return %c0_i32, %c0_i32_0 : i32, i32
  }
  func.func @transform_4(%arg0: i32) -> (i32, i32) {
    %c0_i32 = arith.constant 0 : i32
    %c0_i32_0 = arith.constant 0 : i32
    return %arg0, %c0_i32 : i32, i32
  }
}

</mosaic_0001>

<bundles_post_ra>
// kernel: tpu_custom_call.1
= control target key start
LH: loop header
LB: loop body
LE: loop exit
PB: predicated region body
PF: predicated region fallthrough
CT: control target
= control target key end

     0   :  { %9 = vsyncpa [#allocation3], 0  ;;  %s4161_s0 = inlined_call_operand.hbm [shape: bf16[112,32], index: 0, kind: input, shape index: {}]   ;;  %s4162_s1 = inlined_call_operand.hbm [shape: bf16[32,1536], index: 1, kind: input, shape index: {}]   ;;  %s4163_s2 = inlined_call_operand.hbm [shape: bf16[512,32], index: 2, kind: input, shape index: {}]   ;;  %s4164_s3 = inlined_call_operand.hbm [shape: f32[1,32], index: 3, kind: input, shape index: {}]   ;;  %s4165_s4 = inlined_call_operand.hbm [shape: f32[112,32], index: 4, kind: output, shape index: {}]  }
   0x1   :  { %11 = vsyncpa [#allocation3 + $0x1], 0 }
   0x2   :  { %12 = vsyncpa [#allocation6], 0 }
   0x3   :  { %13 = vsyncpa [#allocation9], 0 }
   0x4   :  { %14 = vsyncpa [#allocation4], 0 }
   0x5   :  { %16 = vsyncpa [#allocation4 + $0x1], 0  ;;  %s3273_s15 = smov 0   ;;  %s3275_s16 = smov 0  }
   0x6   :  { %s3277_s17 = smov 0   ;;  %s3279_s18 = smov 0  }
   0x7 LB: > { %s3294_s19 = sadd.s32 4294967295, %s3234_s18   ;;  %s2378_s20 = sadd.s32 4294967294, %s3234_s18   ;;  %s3234_s18 = sphi %s3279_s18, %s4189_s18   ;;  %s3230_s17 = sphi %s3277_s17, %s4188_s17   ;;  %s3226_s16 = sphi %s3275_s16, %s4187_s16   ;;  %s3222_s15 = sphi %s3273_s15, %s4186_s15  }
   0x8   : > { %p42_p0 = scmp.ne.s32.totalorder %s3226_s16, %s3222_s15  ;;  %p4166_p1 = scmp.eq.s32.totalorder %s3294_s19, 0 }
   0x9   : > { %p135_p3 = scmp.eq.s32.totalorder %s2378_s20, 1  ;;  %p2379_p5 = scmp.ge.s32.totalorder %s3234_s18, 1 }
   0xa   : > { %p3303_p4 = por %p4166_p1, %p42_p0  ;;  %p142_p7 = scmp.lt.s32.totalorder %s3234_s18, 3 }
   0xb   : > { %p3308_p6 = por %p135_p3, %p42_p0  ;;  %s3236_s24 = smov [#allocation5]  }
   0xc   : > { %s4169_s21 = scalar_select %p3303_p4, 1, 0 }
   0xd   : > { %s4170_s22 = scalar_select %p3308_p6, 1, 0 }
   0xe   : > { %p3313_p8 = pnand %p2379_p5, %p142_p7  ;;  %s154_s25 = sshll.u32 %s3236_s24, 4  ;;  %s3317_s25 = int_to_ptr.vmem [resolvable:$true] %s154_s25 }
   0xf   : > { %s3237_s27 = smov [#allocation7]   ;;  %s3046_s5 = scalar_lea.hbm %s4162_s1, 3072 }
  0x10   : > { %s4171_s23 = scalar_select %p3313_p8, 1, 0 }
  0x11   : > { %p2794_p9 = pneg %p3313_p8  ;;  %s167_s28 = sshll.u32 %s3237_s27, 4  ;;  %s3328_s28 = int_to_ptr.vmem [resolvable:$true] %s167_s28 }
  0x12   : > { %p3047_p12 = scmp.ne.s32.totalorder %s4162_s1, %s3046_s5  ;;  %p3053_p5 = scmp.lt.u32.totalorder %s3046_s5, %s4162_s1 }
  0x13   : > { %p3324_p11 = pnand %p2794_p9, %p4166_p1 }
  0x15   : > { %p3338_p13 = pneg %p3324_p11 }
  0x17   : > { %p3049_p0 = pnand %p3338_p13, %p3047_p12 }
  0x19   : > { %p3050_p3 = pneg %p3049_p0 }
  0x1b   : > { %p3055_p7 = pnand %p3053_p5, %p3050_p3 }
  0x1d   : > { %3058 = shalt.err (!%p3055_p7)
}
  0x1e   : > { %s3059_s11 = scalar_lea.vmem %s3317_s25, 3072  ;;  %p3067_p2 = scmp.lt.s32.totalorder %s3317_s25, %s3317_s25 }
  0x1f   : > { %p3060_p9 = scmp.ne.s32.totalorder %s3317_s25, %s3059_s11  ;;  %p3068_p6 = scmp.lt.s32.totalorder %s3059_s11, %s3059_s11 }
  0x21   : > { %p3062_p10 = pnand %p3060_p9, %p3338_p13  ;;  %p3069_p12 = por %p3068_p6, %p3067_p2 }
  0x23   : > { %p3063_p1 = pneg %p3062_p10 }
  0x25   : > { %p3070_p0 = pnand %p3069_p12, %p3063_p1 }
  0x27   : > { %3073 = shalt.err (!%p3070_p0)
}
  0x28   : > { %s3238_s12 = smov 768   ;;  %s3239_s13 = smov 48  }
  0x29   : > { %2797 = dma.hbm_to_vmem [thread:$0]  (!%p3324_p11), %s4162_s1, 3072, %s3317_s25, [#allocation6], %s3238_s12, %s3238_s12, %s3239_s13  }
  0x2a   : > { %s3074_s29 = scalar_lea.hbm %s4163_s2, 4096 }
  0x2b   : > { %p3075_p2 = scmp.ne.s32.totalorder %s4163_s2, %s3074_s29  ;;  %p3081_p10 = scmp.lt.u32.totalorder %s3074_s29, %s4163_s2 }
  0x2d   : > { %p3077_p1 = pnand %p3075_p2, %p3338_p13 }
  0x2f   : > { %p3078_p6 = pneg %p3077_p1 }
  0x31   : > { %p3083_p3 = pnand %p3081_p10, %p3078_p6 }
  0x33   : > { %3086 = shalt.err (!%p3083_p3)
}
  0x34   : > { %s3087_s25 = scalar_lea.vmem %s3328_s28, 4096  ;;  %p3095_p12 = scmp.lt.s32.totalorder %s3328_s28, %s3328_s28 }
  0x35   : > { %p3088_p5 = scmp.ne.s32.totalorder %s3328_s28, %s3087_s25  ;;  %p3096_p0 = scmp.lt.s32.totalorder %s3087_s25, %s3087_s25 }
  0x37   : > { %p3090_p7 = pnand %p3088_p5, %p3338_p13  ;;  %p3097_p2 = por %p3096_p0, %p3095_p12 }
  0x39   : > { %p3091_p9 = pneg %p3090_p7 }
  0x3b   : > { %p3098_p1 = pnand %p3097_p2, %p3091_p9 }
  0x3d   : > { %3101 = shalt.err (!%p3098_p1)
}
  0x3e   : > { %s3240_s9 = smov 64   ;;  %s3241_s10 = smov 4  }
  0x3f   : > { %2800 = dma.hbm_to_vmem [thread:$0]  (!%p3324_p11), %s4163_s2, 4096, %s3328_s28, [#allocation6], %s3240_s9, %s3240_s9, %s3241_s10  }
  0x40   : > { %s3242_s13 = smov [#allocation8]   ;;  %s3386_s20 = sadd.s32 1, %s3234_s18  }
  0x41   : > { %s181_s14 = sshll.u32 %s3242_s13, 4  ;;  %s3102_s29 = scalar_lea.hbm %s4164_s3, 16  ;;  %s182_s14 = int_to_ptr.vmem [resolvable:$true] %s181_s14 }
  0x42   : > { %p3103_p6 = scmp.ne.s32.totalorder %s4164_s3, %s3102_s29  ;;  %p3109_p5 = scmp.lt.u32.totalorder %s3102_s29, %s4164_s3 }
  0x44   : > { %p3105_p10 = pnand %p3103_p6, %p3338_p13 }
  0x46   : > { %p3106_p3 = pneg %p3105_p10 }
  0x48   : > { %p3111_p7 = pnand %p3109_p5, %p3106_p3 }
  0x4a   : > { %3114 = shalt.err (!%p3111_p7)
}
  0x4b   : > { %s3115_s28 = scalar_lea.vmem %s182_s14, 16  ;;  %s3122_s25 = scalar_lea.vmem %s182_s14, 32 }
  0x4c   : > { %p3116_p9 = scmp.ne.s32.totalorder %s182_s14, %s3115_s28  ;;  %p3123_p2 = scmp.lt.s32.totalorder %s182_s14, %s182_s14 }
  0x4d   : > { %p3124_p1 = scmp.lt.s32.totalorder %s3122_s25, %s3115_s28 }
  0x4e   : > { %p3118_p12 = pnand %p3116_p9, %p3338_p13 }
  0x4f   : > { %p3125_p4 = por %p3124_p1, %p3123_p2 }
  0x50   : > { %p3119_p0 = pneg %p3118_p12 }
  0x52   : > { %p3126_p8 = pnand %p3125_p4, %p3119_p0 }
  0x54   : > { %3129 = shalt.err (!%p3126_p8)
}
  0x55   : > { %2803 = dma.hbm_to_vmem [thread:$0]  (!%p3324_p11), %s4164_s3, 16, %s182_s14, [#allocation9]  }
  0x56   : > { %s26_s8 = ssub.s32 %s3234_s18, %s3386_s20  ;;  %s29_s13 = sadd.s32 1, %s3230_s17 }
  0x57   : > { %p27_p4 = scmp.eq.s32.totalorder %s26_s8, 0  ;;  %p36_p8 = scmp.ne.s32.totalorder %s3230_s17, %s3226_s16 }
  0x58   : > { %p37_p13 = scmp.eq.s32.totalorder %s3234_s18, 0  ;;  %p2815_p6 = scmp.lt.s32.totalorder %s3234_s18, 2 }
  0x59   : > { %s3414_s26 = scalar_select %p27_p4, %s3230_s17, %s29_s13  }
  0x5a   : > { %p38_p10 = por %p37_p13, %p36_p8  ;;  %p4174_p3 = scmp.eq.s32.totalorder %s3294_s19, 1 }
  0x5b   : > { %s192_s27 = sand.u32 1, %s3230_s17   ;;  %s2493_s29 = smul.u32 448, %s3234_s18 }
  0x5c   : > { %p3418_p5 = por %p4174_p3, %p36_p8  ;;  %s2775_s30 = smul.u32 28, %s192_s27 }
  0x5d   : > { %p3424_p7 = pnand %p2815_p6, %p38_p10  ;;  %s3431_s7 = scalar_lea.hbm %s4161_s0, %s2493_s29 }
  0x5e   : > { %s196_s28 = scalar_lea.vmem [#allocation2], %s2775_s30  ;;  %s3435_s11 = scalar_lea.sflag [#allocation3], %s192_s27 }
  0x5f   : > { %s203_s25 = sshll.u32 %s196_s28, 4  ;;  %s3130_s12 = scalar_lea.hbm %s3431_s7, 448  ;;  %s3433_s25 = int_to_ptr.vmem [resolvable:$true] %s203_s25 }
  0x60   : > { %p3131_p11 = scmp.ne.s32.totalorder %s3431_s7, %s3130_s12  ;;  %p3132_p9 = pneg %p3424_p7 }
  0x61   : > { %s3135_s29 = scalar_lea.hbm %s4161_s0, 896  ;;  %p3136_p2 = scmp.lt.u32.totalorder %s3431_s7, %s4161_s0 }
  0x62   : > { %p3133_p12 = pnand %p3132_p9, %p3131_p11  ;;  %p3137_p1 = scmp.lt.u32.totalorder %s3135_s29, %s3130_s12 }
  0x63   : > { %p3139_p8 = scmp.lt.u32.totalorder %s3130_s12, %s3431_s7 }
  0x64   : > { %p3134_p0 = pneg %p3133_p12  ;;  %p3138_p4 = por %p3137_p1, %p3136_p2 }
  0x66   : > { %p3140_p13 = por %p3139_p8, %p3138_p4 }
  0x68   : > { %p3141_p6 = pnand %p3140_p13, %p3134_p0 }
  0x6a   : > { %3144 = shalt.err (!%p3141_p6)
}
  0x6b   : > { %s3145_s27 = scalar_lea.vmem %s3433_s25, 448  ;;  %s3243_s30 = smov [#allocation2]  }
  0x6c   : > { %p3146_p10 = scmp.ne.s32.totalorder %s3433_s25, %s3145_s27  ;;  %s3150_s28 = sshll.u32 %s3243_s30, 4  ;;  %s3151_s28 = int_to_ptr.vmem [resolvable:$false] %s3150_s28 }
  0x6d   : > { %s3152_s8 = scalar_lea.vmem %s3151_s28, 896  ;;  %p3153_p12 = scmp.lt.s32.totalorder %s3433_s25, %s3151_s28 }
  0x6e   : > { %p3148_p3 = pnand %p3146_p10, %p3132_p9  ;;  %p3154_p2 = scmp.lt.s32.totalorder %s3152_s8, %s3145_s27 }
  0x70   : > { %p3149_p11 = pneg %p3148_p3  ;;  %p3155_p1 = por %p3154_p2, %p3153_p12 }
  0x72   : > { %p3156_p4 = pnand %p3155_p1, %p3149_p11 }
  0x74   : > { %3159 = shalt.err (!%p3156_p4)
}
  0x75   : > { %2807 = dma.hbm_to_vmem [thread:$0]  (!%p3424_p7), %s3431_s7, 448, %s3433_s25, %s3435_s11, %s3240_s9, %s3240_s9, %s3241_s10  }
  0x76   : > { %p4177_p9 = scmp.ne.s32.totalorder %s4171_s23, 0 }
  0x77   : > { %s3469_s12 = sand.u32 (!%p4177_p9), 1, %s3226_s16   ;;  %p4178_p0 = scmp.ne.s32.totalorder (!%p4177_p9), %s4169_s21, 0 }
  0x78   : > { %215 = sbr.rel (%p4177_p9) target bundleno = 2594 (0xa22), region = 36  ;;  %s218_s29 = scalar_lea.sflag (!%p4177_p9), [#allocation3], %s3469_s12 }
  0x79   : > { %s2776_s13 = smul.u32 (!%p4177_p9), 28, %s3469_s12 }
  0x7b   : > { %s3473_s14 = scalar_lea.vmem (!%p4177_p9), [#allocation2], %s2776_s13 }
  0x7f   : > { %3205 = dma.done.wait (%p4178_p0), %s218_s29, 448  }
  0x80   : > { %3207 = vsyncadd (%p4178_p0), %s218_s29, 4294966848  ;;  %p4179_p7 = scmp.eq.s32.totalorder %s3294_s19, 0 }
  0x82   : > { %3209 = dma.done.wait (%p4179_p7), [#allocation6], 7168   ;;  %p4180_p8 = pmov %p4179_p7 }
  0x83   : > { %p4181_p13 = pmov %p4179_p7 }
  0x84   : > { %3211 = vsyncadd (%p4180_p8), [#allocation6], 4294960128 }
  0x85   : > { %3213 = dma.done.wait (%p4181_p13), [#allocation9], 16   ;;  %p4182_p6 = pmov %p4179_p7 }
  0x86   : > { %v3244_v0 = vmov 0   ;;  %v2862_v1 = vld [vmem:[#allocation5 + $0x4] ss:$48 sps:$4 sm:$0xff]   ;;  %v2864_v2 = vld [vmem:[#allocation5] ss:$48 sps:$4 sm:$0xff]   ;;  %vm430_vm0 = vcmask 261120  }
  0x87   : > { %3215 = vsyncadd (%p4182_p6), [#allocation9], 4294967280  ;;  %475 = vmatprep.mubr.bf16.mxu0 %v3244_v0  ;;  %505 = vmatprep.mubr.bf16.mxu1 %v3244_v0  ;;  %v2865_v3 = vld [vmem:[#allocation5 + $0x64] ss:$48 sps:$4 sm:$0xff]   ;;  %v2867_v4 = vld [vmem:[#allocation5 + $0x60] ss:$48 sps:$4 sm:$0xff]  }
  0x88   : > { %443 = vmatprep.subr.bf16.mxu0 %v2862_v1  ;;  %2767 = vmatprep.subr.bf16.mxu1 %v2862_v1  ;;  %v2871_v5 = vld [vmem:[#allocation5 + $0x14] ss:$48 sps:$4 sm:$0xff]   ;;  %v2869_v7 = vld [vmem:[#allocation5 + $0x10] ss:$48 sps:$4 sm:$0xff]   ;;  %v2884_v17 = vld [vmem:[#allocation5 + $0x8] ss:$48 sps:$4 sm:$0xff]  }
  0x89   : > { %444 = vmatpush1.bf16.msra.mxu0 %v2864_v2  ;;  %2769 = vmatpush1.bf16.msra.mxu1 %v2864_v2  ;;  %v3490_v6 = vld [vmem:[%s3473_s14] sm:$0xff]   ;;  %v3493_v9 = vld [vmem:[%s3473_s14 + $0x18] ss:$0 sps:$4 sm:$0xff]   ;;  %v3501_v12 = vld [vmem:[%s3473_s14 + $0x8] sm:$0xff]   ;;  %vm1087_vm1 = vcmask 1043456   ;;  %vm993_vm3 = vcmask 457728  }
  0x8a   : > { %445 = vmatprep.subr.bf16.mxu0 %v2865_v3  ;;  %2768 = vmatprep.subr.bf16.mxu1 %v2865_v3  ;;  %v2875_v8 = vld [vmem:[#allocation5 + $0x74] ss:$48 sps:$4 sm:$0xff]   ;;  %v2873_v10 = vld [vmem:[#allocation5 + $0x70] ss:$48 sps:$4 sm:$0xff]   ;;  %v2886_v18 = vld [vmem:[#allocation5 + $0xc] ss:$48 sps:$4 sm:$0xff]  }
  0x8b   : > { %v2880_v11 = vld [vmem:[#allocation5 + $0x24] ss:$48 sps:$4 sm:$0xff]   ;;  %v2878_v14 = vld [vmem:[#allocation5 + $0x20] ss:$48 sps:$4 sm:$0xff]   ;;  %v2889_v19 = vld [vmem:[#allocation5 + $0x6c] ss:$48 sps:$4 sm:$0xff]  }
  0x8c   : > { %v3508_v13 = vld [vmem:[%s3473_s14 + $0x10] sm:$0xff]   ;;  %v2881_v16 = vld [vmem:[#allocation5 + $0x80] ss:$48 sps:$4 sm:$0xff]   ;;  %s2777_s21 = smul.u32 56, %s3469_s12  ;;  %s3245_s6 = smov [#allocation10]  }
  0x8d   : > { %446 = vmatpush1.bf16.msra.mxu0 %v2867_v4  ;;  %2770 = vmatpush1.bf16.msra.mxu1 %v2867_v4  ;;  %v2883_v15 = vld [vmem:[#allocation5 + $0x84] ss:$48 sps:$4 sm:$0xff]   ;;  %v2887_v20 = vld [vmem:[#allocation5 + $0x68] ss:$48 sps:$4 sm:$0xff]   ;;  %v2892_v21 = vld [vmem:[#allocation5 + $0x1c] ss:$48 sps:$4 sm:$0xff]  }
  0x8e   : > { %585 = vmatprep.subr.bf16.mxu0 %v2871_v5  ;;  %514 = vmatprep.subr.bf16.mxu1 %v2886_v18  ;;  %v2890_v22 = vld [vmem:[#allocation5 + $0x18] ss:$48 sps:$4 sm:$0xff]   ;;  %v2895_v23 = vld [vmem:[#allocation5 + $0x7c] ss:$48 sps:$4 sm:$0xff]   ;;  %s4094_s23 = scalar_lea.vmem [#allocation10], %s2777_s21  ;;  %s2494_s9 = smul.u32 896, %s3294_s19 }
  0x8f   : > { %v2893_v24 = vld [vmem:[#allocation5 + $0x78] ss:$48 sps:$4 sm:$0xff]   ;;  %v2898_v25 = vld [vmem:[#allocation5 + $0x2c] ss:$48 sps:$4 sm:$0xff]   ;;  %s2276_s10 = sshll.u32 %s4094_s23, 4  ;;  %s2263_s19 = scalar_lea.sflag [#allocation4], %s3469_s12  ;;  %s4115_s10 = int_to_ptr.vmem [resolvable:$true] %s2276_s10 }
  0x90   : > { %2417 = vmatmul.mubr.msk.bf16.vlgmr.msra.gmra.mrb[0].mxu0 %vm430_vm0, %v3490_v6  ;;  %2420 = vmatmul.mubr.msk.bf16.vlgmr.msra.gmra.mrb[0].mxu1 %vm430_vm0, %v3493_v9  ;;  %v2896_v42 = vld [vmem:[#allocation5 + $0x28] ss:$48 sps:$4 sm:$0xff]   ;;  %v2901_v43 = vld [vmem:[#allocation5 + $0x8c] ss:$48 sps:$4 sm:$0xff]   ;;  %s4113_s25 = scalar_lea.hbm %s4165_s4, %s2494_s9  ;;  %s3160_s11 = scalar_lea.vmem %s4115_s10, 896 }
  0x91   : > { %586 = vmatpush1.bf16.msra.mxu0 %v2869_v7  ;;  %485 = vmatprep.mubr.bf16.mxu0 %v3244_v0  ;;  %v2899_v45 = vld [vmem:[#allocation5 + $0x88] ss:$48 sps:$4 sm:$0xff]   ;;  %p3161_p10 = scmp.ne.s32.totalorder %s4115_s10, %s3160_s11  ;;  %s3164_s27 = sshll.u32 %s3245_s6, 4  ;;  %s3165_s27 = int_to_ptr.vmem [resolvable:$false] %s3164_s27 }
  0x92   : > { %587 = vmatprep.subr.bf16.mxu0 %v2875_v8  ;;  %546 = vmatprep.mubr.bf16.mxu1 %v3244_v0  ;;  %s3166_s30 = scalar_lea.vmem %s3165_s27, 1792  ;;  %p3167_p12 = scmp.lt.s32.totalorder %s4115_s10, %s3165_s27 }
  0x93   : > { %515 = vmatpush1.bf16.msra.mxu1 %v2884_v17  ;;  %p3162_p3 = pnand %p3161_p10, %p3418_p5  ;;  %p3168_p2 = scmp.lt.s32.totalorder %s3166_s30, %s3160_s11 }
  0x94   : > { %516 = vmatprep.subr.bf16.mxu1 %v2889_v19 }
  0x95   : > { %588 = vmatpush1.bf16.msra.mxu0 %v2873_v10  ;;  %p3163_p11 = pneg %p3162_p3  ;;  %p3169_p1 = por %p3168_p2, %p3167_p12 }
  0x96   : > { %727 = vmatprep.subr.bf16.mxu0 %v2880_v11 }
  0x97   : > { %517 = vmatpush1.bf16.msra.mxu1 %v2887_v20  ;;  %p3170_p4 = pnand %p3169_p1, %p3163_p11 }
  0x98   : > { %2418 = vmatmul.mubr.msk.bf16.gmra.mrb[4].mxu0 %vm430_vm0, %v3501_v12  ;;  %656 = vmatprep.subr.bf16.mxu1 %v2892_v21 }
  0x99   : > { %495 = vmatprep.mubr.bf16.mxu0 %v3244_v0 }
  0x9a   : > { %2421 = vmatmul.mubr.msk.bf16.vlgmr.msra.gmra.mrb[4].mxu1 %vm430_vm0, %v3490_v6 }
  0x9b   : > { %556 = vmatprep.mubr.bf16.mxu1 %v3244_v0  ;;  %657 = vmatpush1.bf16.msra.mxu1 %v2890_v22 }
  0x9c   : > { %658 = vmatprep.subr.bf16.mxu1 %v2895_v23 }
  0x9f   : > { %659 = vmatpush1.bf16.msra.mxu1 %v2893_v24 }
  0xa0   : > { %2419 = vmatmul.mubr.msk.bf16.gmra.mrb[8].mxu0 %vm430_vm0, %v3508_v13  ;;  %798 = vmatprep.subr.bf16.mxu1 %v2898_v25 }
  0xa1   : > { %617 = vmatprep.mubr.bf16.mxu0 %v3244_v0 }
  0xa2   : > { %2422 = vmatmul.mubr.msk.bf16.gmra.mrb[8].mxu1 %vm430_vm0, %v3501_v12 }
  0xa3   : > { %566 = vmatprep.mubr.bf16.mxu1 %v3244_v0 }
  0xa8   : > { %2425 = vmatmul.mubr.msk.bf16.vlgmr.msra.gmra.mrb[12].mxu0 %vm430_vm0, %v3490_v6 }
  0xa9   : > { %627 = vmatprep.mubr.bf16.mxu0 %v3244_v0  ;;  %728 = vmatpush1.bf16.msra.mxu0 %v2878_v14 }
  0xaa   : > { %729 = vmatprep.subr.bf16.mxu0 %v2883_v15  ;;  %2423 = vmatmul.mubr.msk.bf16.gmra.mrb[12].mxu1 %vm430_vm0, %v3508_v13 }
  0xab   : > { %576 = vmatprep.mubr.bf16.mxu1 %v3244_v0 }
  0xad   : > { %730 = vmatpush1.bf16.msra.mxu0 %v2881_v16 }
  0xb0   : > { %2426 = vmatmul.mubr.msk.bf16.gmra.mrb[16].mxu0 %vm430_vm0, %v3501_v12 }
  0xb1   : > { %637 = vmatprep.mubr.bf16.mxu0 %v3244_v0 }
  0xb2   : > { %2424 = vmatmul.mubr.msk.bf16.gmra.mrb[16].mxu1 %vm430_vm0, %v3493_v9 }
  0xb3   : > { %688 = vmatprep.mubr.bf16.mxu1 %v3244_v0 }
  0xb8   : > { %2427 = vmatmul.mubr.msk.bf16.gmra.mrb[20].mxu0 %vm430_vm0, %v3508_v13 }
  0xb9   : > { %647 = vmatprep.mubr.bf16.mxu0 %v3244_v0 }
  0xba   : > { %2429 = vmatmul.mubr.msk.bf16.vlgmr.msra.gmra.mrb[20].mxu1 %vm430_vm0, %v3490_v6 }
  0xbb   : > { %698 = vmatprep.mubr.bf16.mxu1 %v3244_v0  ;;  %799 = vmatpush1.bf16.msra.mxu1 %v2896_v42 }
  0xbc   : > { %800 = vmatprep.subr.bf16.mxu1 %v2901_v43 }
  0xbf   : > { %801 = vmatpush1.bf16.msra.mxu1 %v2899_v45 }
  0xc0   : > { %2428 = vmatmul.mubr.msk.bf16.gmra.mrb[24].mxu0 %vm430_vm0, %v3493_v9 }
  0xc1   : > { %759 = vmatprep.mubr.bf16.mxu0 %v3244_v0 }
  0xc2   : > { %2430 = vmatmul.mubr.msk.bf16.gmra.mrb[24].mxu1 %vm430_vm0, %v3501_v12 }
  0xc3   : > { %708 = vmatprep.mubr.bf16.mxu1 %v3244_v0 }
  0xc8   : > { %2433 = vmatmul.mubr.msk.bf16.vlgmr.msra.gmra.mrb[28].mxu0 %vm430_vm0, %v3490_v6 }
  0xc9   : > { %769 = vmatprep.mubr.bf16.mxu0 %v3244_v0 }
  0xca   : > { %2431 = vmatmul.mubr.msk.bf16.gmra.mrb[28].mxu1 %vm430_vm0, %v3508_v13 }
  0xcb   : > { %718 = vmatprep.mubr.bf16.mxu1 %v3244_v0 }
  0xd0   : > { %2434 = vmatmul.mubr.msk.bf16.gmra.mrb[32].mxu0 %vm430_vm0, %v3501_v12 }
  0xd1   : > { %779 = vmatprep.mubr.bf16.mxu0 %v3244_v0 }
  0xd2   : > { %2432 = vmatmul.mubr.msk.bf16.gmra.mrb[32].mxu1 %vm430_vm0, %v3493_v9 }
  0xd3   : > { %830 = vmatprep.mubr.bf16.mxu1 %v3244_v0 }
  0xd8   : > { %2435 = vmatmul.mubr.msk.bf16.gmra.mrb[36].mxu0 %vm430_vm0, %v3508_v13 }
  0xd9   : > { %789 = vmatprep.mubr.bf16.mxu0 %v3244_v0 }
  0xda   : > { %2437 = vmatmul.mubr.msk.bf16.vlgmr.msra.gmra.mrb[36].mxu1 %vm430_vm0, %v3490_v6 }
  0xdb   : > { %840 = vmatprep.mubr.bf16.mxu1 %v3244_v0 }
  0xe0   : > { %2436 = vmatmul.mubr.msk.bf16.gmra.mrb[40].mxu0 %vm430_vm0, %v3493_v9 }
  0xe2   : > { %2438 = vmatmul.mubr.msk.bf16.gmra.mrb[40].mxu1 %vm430_vm0, %v3501_v12 }
  0xe3   : > { %850 = vmatprep.mubr.bf16.mxu1 %v3244_v0 }
  0xea   : > { %2439 = vmatmul.mubr.msk.bf16.gmra.mrb[44].mxu1 %vm430_vm0, %v3508_v13 }
  0xeb   : > { %860 = vmatprep.mubr.bf16.mxu1 %v3244_v0 }
  0xf2   : > { %2440 = vmatmul.mubr.msk.bf16.gmra.mrb[48].mxu1 %vm430_vm0, %v3493_v9 }
 0x163   : > { %v477_v26 = vpop.f32.mrb[0].mxu0  ;;  %v3544_v27 = vpop.f32.mrb[0].mxu1 }
 0x164   : > { %v3547_v28 = vpop.f32.mrb[1].mxu0  ;;  %v3549_v29 = vpop.f32.mrb[1].mxu1  ;;  %v905_v12 = vpack.c.bf16 %v3544_v27, %v3544_v27 }
 0x165   : > { %v481_v30 = vpop.f32.mrb[2].mxu0  ;;  %v511_v31 = vpop.f32.mrb[2].mxu1 }
 0x166   : > { %v869_v32 = vpack.c.bf16 %v481_v30, %v477_v26  ;;  %v3551_v33 = vpop.f32.mrb[3].mxu0  ;;  %v512_v34 = vpop.f32.mrb[3].mxu1 }
 0x167   : > { %v870_v35 = vpack.c.bf16 %v3551_v33, %v3547_v28 }
 0x168   : > { %2647 = vmatprep.mubr.bf16.mxu0 %v869_v32 }
 0x16b   : > { %v3557_v36 = vpop.f32.mrb[4].mxu0 }
 0x16c   : > { %v3560_v37 = vpop.f32.mrb[5].mxu0 }
 0x16d   : > { %v3562_v38 = vpop.f32.mrb[6].mxu0 }
 0x16e   : > { %v881_v39 = vpack.c.bf16 %v3562_v38, %v3557_v36  ;;  %v3566_v40 = vpop.f32.mrb[7].mxu0  ;;  %v906_v38 = vpack.c.bf16 %v3549_v29, %v3549_v29 }
 0x16f   : > { %v882_v41 = vpack.c.bf16 %v3566_v40, %v3560_v37 }
 0x173   : > { %v497_v44 = vpop.f32.mrb[8].mxu0 }
 0x174   : > { %v3573_v46 = vpop.f32.mrb[9].mxu0 }
 0x175   : > { %v501_v47 = vpop.f32.mrb[10].mxu0 }
 0x176   : > { %v893_v48 = vpack.c.bf16 %v501_v47, %v497_v44  ;;  %v3575_v49 = vpop.f32.mrb[11].mxu0 }
 0x177   : > { %v894_v50 = vpack.c.bf16 %v3575_v49, %v3573_v46 }
 0x17b   : > { %v619_v51 = vpop.f32.mrb[12].mxu0 }
 0x17c   : > { %v621_v52 = vpop.f32.mrb[13].mxu0 }
 0x17d   : > { %v623_v53 = vpop.f32.mrb[14].mxu0 }
 0x17e   : > { %v873_v54 = vpack.c.bf16 %v623_v53, %v619_v51  ;;  %v625_v55 = vpop.f32.mrb[15].mxu0 }
 0x17f   : > { %v874_v56 = vpack.c.bf16 %v625_v55, %v621_v52 }
 0x180   : > { %2639 = vmatprep.subr.bf16.mxu0 %v873_v54 }
 0x181   : > { %2640 = vmatpush3.bf16.xpose.msra.mxu0 %v873_v54 }
 0x183   : > { %v629_v57 = vpop.f32.mrb[16].mxu0 }
 0x184   : > { %v631_v58 = vpop.f32.mrb[17].mxu0 }
 0x185   : > { %v633_v59 = vpop.f32.mrb[18].mxu0 }
 0x186   : > { %v885_v60 = vpack.c.bf16 %v633_v59, %v629_v57  ;;  %v635_v61 = vpop.f32.mrb[19].mxu0 }
 0x187   : > { %v886_v62 = vpack.c.bf16 %v635_v61, %v631_v58 }
 0x188   : > { %2641 = vmatprep.subr.bf16.mxu0 %v885_v60 }
 0x189   : > { %2642 = vmatpush3.bf16.xpose.msra.mxu0 %v885_v60 }
 0x18b   : > { %v639_v63 = vpop.f32.mrb[20].mxu0 }
 0x18c   : > { %v641_v1 = vpop.f32.mrb[21].mxu0 }
 0x18d   : > { %v643_v2 = vpop.f32.mrb[22].mxu0 }
 0x18e   : > { %v897_v3 = vpack.c.bf16 %v643_v2, %v639_v63  ;;  %v645_v4 = vpop.f32.mrb[23].mxu0 }
 0x18f   : > { %v898_v5 = vpack.c.bf16 %v645_v4, %v641_v1 }
 0x190   : > { %2643 = vmatprep.subr.bf16.mxu0 %v897_v3 }
 0x191   : > { %2644 = vmatpush3.bf16.xpose.msra.mxu0 %v897_v3 }
 0x193   : > { %v649_v7 = vpop.f32.mrb[24].mxu0 }
 0x194   : > { %v909_v8 = vpack.c.bf16 %v649_v7, %v649_v7  ;;  %v651_v10 = vpop.f32.mrb[25].mxu0 }
 0x195   : > { %v653_v11 = vpop.f32.mrb[26].mxu0  ;;  %v910_v32 = vpack.c.bf16 %v651_v10, %v651_v10 }
 0x196   : > { %v654_v14 = vpop.f32.mrb[27].mxu0  ;;  %2645 = vmatprep.subr.bf16.mxu0 %v909_v8 }
 0x199   : > { %2646 = vmatpush3.bf16.xpose.msra.mxu0 %v909_v8 }
 0x19a   : > { %2671 = vmatprep.subr.bf16.mxu0 %v874_v56 }
 0x19b   : > { %v761_v15 = vpop.f32.mrb[28].mxu0 }
 0x19c   : > { %v763_v16 = vpop.f32.mrb[29].mxu0 }
 0x19d   : > { %v765_v17 = vpop.f32.mrb[30].mxu0 }
 0x19e   : > { %v877_v18 = vpack.c.bf16 %v765_v17, %v761_v15  ;;  %v767_v6 = vpop.f32.mrb[31].mxu0 }
 0x19f   : > { %v3594_v19 = vpack.c.bf16 %v767_v6, %v763_v16 }
 0x1a0   : > { %2648 = vmatmul.mubr.bf16.vlgmr.msra.gmra.mrb[44].mxu0 %v881_v39  ;;  %2655 = vmatprep.subr.bf16.mxu1 %v877_v18  ;;  %v917_v39 = vlaneseq }
 0x1a1   : > { %2651 = vmatprep.mubr.bf16.mxu0 %v893_v48  ;;  %2672 = vmatpush3.bf16.xpose.msra.mxu0 %v874_v56 }
 0x1a2   : > { %2673 = vmatprep.subr.bf16.mxu0 %v886_v62  ;;  %2656 = vmatpush3.bf16.msra.mxu1 %v877_v18  ;;  %v3626_v42 = vand.u32 127, %v917_v39 }
 0x1a3   : > { %v771_v20 = vpop.f32.mrb[32].mxu0 }
 0x1a4   : > { %v773_v21 = vpop.f32.mrb[33].mxu0  ;;  %vm919_vm2 = vcmp.lt.s32.totalorder %v3626_v42, 49 }
 0x1a5   : > { %v775_v22 = vpop.f32.mrb[34].mxu0 }
 0x1a6   : > { %v889_v23 = vpack.c.bf16 %v775_v22, %v771_v20  ;;  %v777_v24 = vpop.f32.mrb[35].mxu0 }
 0x1a7   : > { %v3604_v25 = vpack.c.bf16 %v777_v24, %v773_v21 }
 0x1a8   : > { %2652 = vmatmul.mubr.bf16.gmra.mrb[48].mxu0 %v905_v12  ;;  %2657 = vmatprep.subr.bf16.mxu1 %v889_v23 }
 0x1a9   : > { %2674 = vmatpush3.bf16.xpose.msra.mxu0 %v886_v62  ;;  %2679 = vmatprep.mubr.bf16.mxu0 %v870_v35 }
 0x1aa   : > { %2675 = vmatprep.subr.bf16.mxu0 %v898_v5  ;;  %2658 = vmatpush3.bf16.msra.mxu1 %v889_v23 }
 0x1ab   : > { %v781_v13 = vpop.f32.mrb[36].mxu0 }
 0x1ac   : > { %v783_v26 = vpop.f32.mrb[37].mxu0 }
 0x1ad   : > { %v785_v0 = vpop.f32.mrb[38].mxu0 }
 0x1ae   : > { %v901_v27 = vpack.c.bf16 %v785_v0, %v781_v13  ;;  %v787_v30 = vpop.f32.mrb[39].mxu0 }
 0x1af   : > { %v3611_v31 = vpack.c.bf16 %v787_v30, %v783_v26 }
 0x1b0   : > { %2659 = vmatprep.subr.bf16.mxu1 %v901_v27 }
 0x1b1   : > { %2676 = vmatpush3.bf16.xpose.msra.mxu0 %v898_v5  ;;  %2660 = vmatpush3.bf16.msra.mxu1 %v901_v27 }
 0x1b2   : > { %2677 = vmatprep.subr.bf16.mxu0 %v910_v32 }
 0x1b3   : > { %v791_v34 = vpop.f32.mrb[40].mxu0 }
 0x1b4   : > { %v913_v28 = vpack.c.bf16 %v791_v34, %v791_v34  ;;  %v3613_v33 = vpop.f32.mrb[41].mxu0 }
 0x1b5   : > { %v795_v35 = vpop.f32.mrb[42].mxu0 }
 0x1b6   : > { %v1089_v36 = vsel %vm1087_vm1, %v913_v28, 0  ;;  %2771 = vmatprep.subr.msk.bf16.mxu1 %vm1087_vm1, %v913_v28  ;;  %v796_v9 = vpop.f32.mrb[43].mxu0 }
 0x1b7   : > { %2662 = vmatpush3.bf16.msra.mxu1 %v1089_v36 }
 0x1b8   : > { %2687 = vmatprep.subr.bf16.mxu1 %v3594_v19 }
 0x1b9   : > { %2678 = vmatpush3.bf16.xpose.msra.mxu0 %v910_v32 }
 0x1c0   : > { %2680 = vmatmul.mubr.bf16.vlgmr.msra.gmra.mrb[52].mxu0 %v882_v41 }
 0x1c1   : > { %2683 = vmatprep.mubr.bf16.mxu0 %v894_v50 }
 0x1c8   : > { %2684 = vmatmul.mubr.bf16.gmra.mrb[56].mxu0 %v906_v38 }
 0x273   : > { %v2649_v43 = vpop.f32.mrb[44].mxu0 }
 0x274   : > { %v988_v44 = vsel %vm919_vm2, %v2649_v43, -1e+30  ;;  %v954_v37 = vpop.f32.mrb[45].mxu0 }
 0x275   : > { %v986_v40 = vsel %vm919_vm2, %v954_v37, -1e+30  ;;  %v2650_v41 = vpop.f32.mrb[46].mxu0  ;;  %v1000_v45 = vsel %vm993_vm3, %v988_v44, -inf }
 0x276   : > { %v3636_v29 = vsel %vm919_vm2, %v2650_v41, -1e+30  ;;  %1001 = vmax.xlane.f32.xlu1 %v1000_v45  ;;  %v957_v46 = vpop.f32.mrb[47].mxu0  ;;  %v994_v47 = vsel %vm993_vm3, %v986_v40, -inf }
 0x277   : > { %v987_v48 = vsel %vm919_vm2, %v957_v46, -1e+30  ;;  %995 = vmax.xlane.f32.xlu0 %v994_v47  ;;  %v1003_v49 = vsel %vm993_vm3, %v3636_v29, -inf }
 0x278   : > { %v997_v50 = vsel %vm993_vm3, %v987_v48, -inf }
 0x27a   : > { %1004 = vmax.xlane.f32.xlu1 %v1003_v49 }
 0x27b   : > { %998 = vmax.xlane.f32.xlu0 %v997_v50  ;;  %v2653_v51 = vpop.f32.mrb[48].mxu0 }
 0x27c   : > { %v970_v52 = vpop.f32.mrb[49].mxu0  ;;  %v3646_v53 = vsel %vm919_vm2, %v2653_v51, -1e+30 }
 0x27d   : > { %v990_v54 = vsel %vm919_vm2, %v970_v52, -1e+30  ;;  %v2654_v55 = vpop.f32.mrb[50].mxu0  ;;  %v1012_v60 = vsel %vm993_vm3, %v3646_v53, -inf }
 0x27e   : > { %v973_v56 = vpop.f32.mrb[51].mxu0  ;;  %v1006_v57 = vsel %vm993_vm3, %v990_v54, -inf }
 0x27f   : > { %v991_v58 = vsel %vm919_vm2, %v973_v56, -1e+30  ;;  %1007 = vmax.xlane.f32.xlu0 %v1006_v57 }
 0x280   : > { %v1009_v59 = vsel %vm993_vm3, %v991_v58, -inf }
 0x281   : > { %1010 = vmax.xlane.f32.xlu1 %v1009_v59  ;;  %v3728_v59 = vpop.f32.mrb[4].mxu1 }
 0x283   : > { %1013 = vmax.xlane.f32.xlu0 %v1012_v60  ;;  %v3730_v60 = vpop.f32.mrb[5].mxu1 }
 0x293   : > { %v2681_v61 = vpop.f32.mrb[52].mxu0 }
 0x294   : > { %v1193_v62 = vpop.f32.mrb[53].mxu0  ;;  %v3664_v4 = vsel %vm919_vm2, %v2681_v61, -1e+30 }
 0x295   : > { %v3658_v63 = vsel %vm919_vm2, %v1193_v62, -1e+30  ;;  %v2682_v1 = vpop.f32.mrb[54].mxu0  ;;  %v1236_v10 = vsel %vm993_vm3, %v3664_v4, -inf  ;;  %v3732_v62 = vpop.f32.mrb[6].mxu1 }
 0x296   : > { %v1196_v2 = vpop.f32.mrb[55].mxu0  ;;  %v1230_v3 = vsel %vm993_vm3, %v3658_v63, -inf  ;;  %v3674_v8 = vsel %vm919_vm2, %v2682_v1, -1e+30 }
 0x297   : > { %v3668_v5 = vsel %vm919_vm2, %v1196_v2, -1e+30  ;;  %1231 = vmax.xlane.f32.xlu1 %v1230_v3  ;;  %v1239_v15 = vsel %vm993_vm3, %v3674_v8, -inf  ;;  %v871_v2 = vpack.c.bf16 %v3732_v62, %v3728_v59  ;;  %v3737_v3 = vpop.f32.mrb[7].mxu1 }
 0x298   : > { %v1233_v7 = vsel %vm993_vm3, %v3668_v5, -inf }
 0x299   : > { %1234 = vmax.xlane.f32.xlu0 %v1233_v7 }
 0x29b   : > { %v2685_v11 = vpop.f32.mrb[56].mxu0  ;;  %1237 = vmax.xlane.f32.xlu1 %v1236_v10  ;;  %v872_v10 = vpack.c.bf16 %v3737_v3, %v3730_v60 }
 0x29c   : > { %v1209_v14 = vpop.f32.mrb[57].mxu0  ;;  %v3688_v20 = vsel %vm919_vm2, %v2685_v11, -1e+30 }
 0x29d   : > { %v3682_v16 = vsel %vm919_vm2, %v1209_v14, -1e+30  ;;  %1240 = vmax.xlane.f32.xlu0 %v1239_v15  ;;  %v2686_v17 = vpop.f32.mrb[58].mxu0  ;;  %v1248_v22 = vsel %vm993_vm3, %v3688_v20, -inf  ;;  %v3742_v15 = vpop.f32.mrb[8].mxu1 }
 0x29e   : > { %v1212_v18 = vpop.f32.mrb[59].mxu0  ;;  %v1242_v6 = vsel %vm993_vm3, %v3682_v16, -inf }
 0x29f   : > { %v3692_v12 = vsel %vm919_vm2, %v1212_v18, -1e+30  ;;  %1243 = vmax.xlane.f32.xlu1 %v1242_v6  ;;  %v3744_v18 = vpop.f32.mrb[9].mxu1 }
 0x2a0   : > { %v1245_v21 = vsel %vm993_vm3, %v3692_v12, -inf }
 0x2a1   : > { %1246 = vmax.xlane.f32.xlu0 %v1245_v21  ;;  %v3747_v21 = vpop.f32.mrb[10].mxu1 }
 0x2a3   : > { %1249 = vmax.xlane.f32.xlu1 %v1248_v22 }
 0x303   : > { %v1002_v23 = vpop.xlane.xlu1 %1001 }
 0x304   : > { %v1017_v24 = vsub.f32 %v988_v44, %v1002_v23  ;;  %v996_v13 = vpop.xlane.xlu0 %995  ;;  %v3749_v23 = vpop.f32.mrb[11].mxu1 }
 0x305   : > { %v1015_v26 = vsub.f32 %v986_v40, %v996_v13 }
 0x306   : > { %v1026_v0 = vmul.f32 1.442695, %v1017_v24 }
 0x307   : > { %v1022_v27 = vmul.f32 1.442695, %v1015_v26  ;;  %v1005_v30 = vpop.xlane.xlu1 %1004  ;;  %v3752_v26 = vpop.f32.mrb[12].mxu1 }
 0x308   : > { %v1018_v32 = vsub.f32 %v3636_v29, %v1005_v30  ;;  %v999_v34 = vpop.xlane.xlu0 %998 }
 0x309   : > { %2934 = vpow2.f32 %v1022_v27  ;;  %v1016_v28 = vsub.f32 %v987_v48, %v999_v34 }
 0x30a   : > { %2936 = vpow2.f32 %v1026_v0  ;;  %v1028_v35 = vmul.f32 1.442695, %v1018_v32  ;;  %v3754_v0 = vpop.f32.mrb[13].mxu1 }
 0x30b   : > { %v1024_v36 = vmul.f32 1.442695, %v1016_v28  ;;  %v3757_v32 = vpop.f32.mrb[14].mxu1 }
 0x30c   : > { %v1008_v9 = vpop.xlane.xlu0 %1007  ;;  %v3759_v34 = vpop.f32.mrb[15].mxu1 }
 0x30d   : > { %2938 = vpow2.f32 %v1024_v36  ;;  %v1019_v38 = vsub.f32 %v990_v54, %v1008_v9  ;;  %v3762_v36 = vpop.f32.mrb[16].mxu1 }
 0x30e   : > { %v1011_v39 = vpop.xlane.xlu1 %1010  ;;  %2940 = vpow2.f32 %v1028_v35  ;;  %v3764_v9 = vpop.f32.mrb[17].mxu1  ;;  %v907_v59 = vpack.c.bf16 %v3762_v36, %v3762_v36 }
 0x30f   : > { %v1030_v43 = vmul.f32 1.442695, %v1019_v38  ;;  %v1020_v44 = vsub.f32 %v991_v58, %v1011_v39  ;;  %v908_v60 = vpack.c.bf16 %v3764_v9, %v3764_v9 }
 0x310   : > { %v1014_v37 = vpop.xlane.xlu0 %1013 }
 0x311   : > { %2942 = vpow2.f32 %v1030_v43  ;;  %v1032_v40 = vmul.f32 1.442695, %v1020_v44  ;;  %v1021_v41 = vsub.f32 %v3646_v53, %v1014_v37  ;;  %v582_v43 = vpop.f32.mrb[18].mxu1  ;;  %v884_v44 = vpack.c.bf16 %v3749_v23, %v3744_v18 }
 0x312   : > { %v583_v37 = vpop.f32.mrb[19].mxu1 }
 0x313   : > { %v3700_v45 = vpop.eup %2934  ;;  %2944 = vpow2.f32 %v1032_v40  ;;  %v1034_v29 = vmul.f32 1.442695, %v1021_v41  ;;  %v690_v41 = vpop.f32.mrb[20].mxu1 }
 0x314   : > { %v1036_v46 = vsel %vm993_vm3, %v3700_v45, 0.0  ;;  %v3704_v47 = vpop.eup %2936 }
 0x315   : > { %2946 = vpow2.f32 %v1034_v29  ;;  %1037 = vadd.xlane.f32.xlu0 %v1036_v46  ;;  %v1042_v49 = vsel %vm993_vm3, %v3704_v47, 0.0  ;;  %v692_v46 = vpop.f32.mrb[21].mxu1 }
 0x317   : > { %v3706_v48 = vpop.eup %2938 }
 0x318   : > { %v1039_v50 = vsel %vm993_vm3, %v3706_v48, 0.0  ;;  %v3712_v51 = vpop.eup %2940 }
 0x319   : > { %1043 = vadd.xlane.f32.xlu0 %v1042_v49  ;;  %1040 = vadd.xlane.f32.xlu1 %v1039_v50  ;;  %v1045_v54 = vsel %vm993_vm3, %v3712_v51, 0.0 }
 0x31b   : > { %v3714_v52 = vpop.eup %2942 }
 0x31c   : > { %v1048_v53 = vsel %vm993_vm3, %v3714_v52, 0.0 }
 0x31d   : > { %v3720_v55 = vpop.eup %2944  ;;  %1049 = vadd.xlane.f32.xlu0 %v1048_v53  ;;  %1046 = vadd.xlane.f32.xlu1 %v1045_v54 }
 0x31e   : > { %v1051_v58 = vsel %vm993_vm3, %v3720_v55, 0.0 }
 0x31f   : > { %v3722_v56 = vpop.eup %2946 }
 0x320   : > { %v1054_v57 = vsel %vm993_vm3, %v3722_v56, 0.0 }
 0x321   : > { %1055 = vadd.xlane.f32.xlu0 %v1054_v57  ;;  %1052 = vadd.xlane.f32.xlu1 %v1051_v58 }
 0x324   : > { %v1232_v61 = vpop.xlane.xlu1 %1231 }
 0x325   : > { %v1251_v1 = vsub.f32 %v3658_v63, %v1232_v61 }
 0x326   : > { %v1235_v7 = vpop.xlane.xlu0 %1234 }
 0x327   : > { %v1258_v11 = vmul.f32 1.442695, %v1251_v1  ;;  %v1252_v14 = vsub.f32 %v3668_v5, %v1235_v7  ;;  %v895_v7 = vpack.c.bf16 %v3757_v32, %v3752_v26 }
 0x328   : > { %v1238_v17 = vpop.xlane.xlu1 %1237 }
 0x329   : > { %2948 = vpow2.f32 %v1258_v11  ;;  %v1260_v6 = vmul.f32 1.442695, %v1252_v14  ;;  %v1253_v63 = vsub.f32 %v3664_v4, %v1238_v17 }
 0x32a   : > { %v1241_v22 = vpop.xlane.xlu0 %1240 }
 0x32b   : > { %2950 = vpow2.f32 %v1260_v6  ;;  %v1262_v24 = vmul.f32 1.442695, %v1253_v63  ;;  %v1254_v13 = vsub.f32 %v3674_v8, %v1241_v22 }
 0x32c   : > { %v1244_v5 = vpop.xlane.xlu1 %1243 }
 0x32d   : > { %2952 = vpow2.f32 %v1262_v24  ;;  %v1264_v27 = vmul.f32 1.442695, %v1254_v13  ;;  %v1255_v30 = vsub.f32 %v3682_v16, %v1244_v5  ;;  %v883_v16 = vpack.c.bf16 %v3747_v21, %v3742_v15 }
 0x32e   : > { %v1247_v4 = vpop.xlane.xlu0 %1246 }
 0x32f   : > { %2954 = vpow2.f32 %v1264_v27  ;;  %v1266_v28 = vmul.f32 1.442695, %v1255_v30  ;;  %v1256_v35 = vsub.f32 %v3692_v12, %v1247_v4 }
 0x330   : > { %v1250_v8 = vpop.xlane.xlu1 %1249 }
 0x331   : > { %2956 = vpow2.f32 %v1266_v28  ;;  %v1268_v38 = vmul.f32 1.442695, %v1256_v35  ;;  %v1257_v39 = vsub.f32 %v3688_v20, %v1250_v8  ;;  %v694_v20 = vpop.f32.mrb[22].mxu1 }
 0x332   : > { %v696_v53 = vpop.f32.mrb[23].mxu1  ;;  %v3791_v6 = vpack.c.bf16 %v694_v20, %v690_v41 }
 0x333   : > { %v3771_v40 = vpop.eup %2948  ;;  %2958 = vpow2.f32 %v1268_v38  ;;  %v1270_v12 = vmul.f32 1.442695, %v1257_v39  ;;  %v700_v57 = vpop.f32.mrb[24].mxu1  ;;  %v3793_v63 = vpack.c.bf16 %v696_v53, %v692_v46 }
 0x334   : > { %v1272_v29 = vsel %vm993_vm3, %v3771_v40, 0.0  ;;  %v702_v61 = vpop.f32.mrb[25].mxu1 }
 0x335   : > { %v3775_v49 = vpop.eup %2950  ;;  %2960 = vpow2.f32 %v1270_v12  ;;  %1273 = vadd.xlane.f32.xlu1 %v1272_v29  ;;  %v704_v14 = vpop.f32.mrb[26].mxu1 }
 0x336   : > { %v1275_v50 = vsel %vm993_vm3, %v3775_v49, 0.0  ;;  %v3795_v22 = vpack.c.bf16 %v704_v14, %v700_v57  ;;  %v706_v24 = vpop.f32.mrb[27].mxu1 }
 0x337   : > { %v3779_v54 = vpop.eup %2952  ;;  %1276 = vadd.xlane.f32.xlu0 %v1275_v50  ;;  %v3799_v5 = vpack.c.bf16 %v706_v24, %v702_v61  ;;  %v710_v30 = vpop.f32.mrb[28].mxu1 }
 0x338   : > { %v1278_v58 = vsel %vm993_vm3, %v3779_v54, 0.0  ;;  %v712_v28 = vpop.f32.mrb[29].mxu1 }
 0x339   : > { %v3783_v1 = vpop.eup %2954  ;;  %1279 = vadd.xlane.f32.xlu1 %v1278_v58  ;;  %v714_v8 = vpop.f32.mrb[30].mxu1 }
 0x33a   : > { %v1281_v17 = vsel %vm993_vm3, %v3783_v1, 0.0  ;;  %v3809_v39 = vpack.c.bf16 %v714_v8, %v710_v30  ;;  %v716_v43 = vpop.f32.mrb[31].mxu1 }
 0x33b   : > { %v3797_v13 = vpop.eup %2956  ;;  %1282 = vadd.xlane.f32.xlu0 %v1281_v17  ;;  %v3813_v12 = vpack.c.bf16 %v716_v43, %v712_v28  ;;  %v3815_v41 = vpop.f32.mrb[32].mxu1 }
 0x33c   : > { %v1284_v27 = vsel %vm993_vm3, %v3797_v13, 0.0  ;;  %v3817_v29 = vpop.f32.mrb[33].mxu1 }
 0x33d   : > { %v3803_v4 = vpop.eup %2958  ;;  %1285 = vadd.xlane.f32.xlu1 %v1284_v27  ;;  %v724_v46 = vpop.f32.mrb[34].mxu1 }
 0x33e   : > { %v1287_v35 = vsel %vm993_vm3, %v3803_v4, 0.0  ;;  %v725_v20 = vpop.f32.mrb[35].mxu1 }
 0x33f   : > { %v3807_v38 = vpop.eup %2960  ;;  %1288 = vadd.xlane.f32.xlu0 %v1287_v35  ;;  %v832_v50 = vpop.f32.mrb[36].mxu1 }
 0x340   : > { %v1290_v37 = vsel %vm993_vm3, %v3807_v38, 0.0  ;;  %v834_v53 = vpop.f32.mrb[37].mxu1 }
 0x341   : > { %1291 = vadd.xlane.f32.xlu1 %v1290_v37  ;;  %v836_v57 = vpop.f32.mrb[38].mxu1 }
 0x342   : > { %v879_v58 = vpack.c.bf16 %v836_v57, %v832_v50  ;;  %v838_v61 = vpop.f32.mrb[39].mxu1 }
 0x343   : > { %v3819_v14 = vpack.c.bf16 %v838_v61, %v834_v53  ;;  %v842_v17 = vpop.f32.mrb[40].mxu1 }
 0x344   : > { %v844_v24 = vpop.f32.mrb[41].mxu1  ;;  %2719 = vmatprep.subr.bf16.mxu0 %v879_v58 }
 0x345   : > { %v846_v27 = vpop.f32.mrb[42].mxu1  ;;  %2720 = vmatpush3.bf16.msra.mxu0 %v879_v58 }
 0x346   : > { %v891_v30 = vpack.c.bf16 %v846_v27, %v842_v17  ;;  %v848_v28 = vpop.f32.mrb[43].mxu1 }
 0x347   : > { %v852_v35 = vpop.f32.mrb[44].mxu1  ;;  %v3823_v57 = vpack.c.bf16 %v848_v28, %v844_v24 }
 0x348   : > { %v854_v8 = vpop.f32.mrb[45].mxu1  ;;  %2721 = vmatprep.subr.bf16.mxu0 %v891_v30 }
 0x349   : > { %v856_v43 = vpop.f32.mrb[46].mxu1  ;;  %2722 = vmatpush3.bf16.msra.mxu0 %v891_v30 }
 0x34a   : > { %v903_v37 = vpack.c.bf16 %v856_v43, %v852_v35  ;;  %v858_v46 = vpop.f32.mrb[47].mxu1 }
 0x34b   : > { %v862_v20 = vpop.f32.mrb[48].mxu1  ;;  %v3825_v58 = vpack.c.bf16 %v858_v46, %v854_v8 }
 0x34c   : > { %2723 = vmatprep.subr.bf16.mxu0 %v903_v37  ;;  %v915_v50 = vpack.c.bf16 %v862_v20, %v862_v20  ;;  %v3828_v61 = vpop.f32.mrb[49].mxu1 }
 0x34d   : > { %2724 = vmatpush3.bf16.msra.mxu0 %v903_v37  ;;  %v866_v17 = vpop.f32.mrb[50].mxu1  ;;  %v916_v62 = vpack.c.bf16 %v3828_v61, %v3828_v61 }
 0x34e   : > { %v1559_v53 = vsel %vm1087_vm1, %v915_v50, 0  ;;  %2773 = vmatprep.subr.msk.bf16.mxu0 %vm1087_vm1, %v915_v50  ;;  %v867_v27 = vpop.f32.mrb[51].mxu1 }
 0x351   : > { %2726 = vmatpush3.bf16.msra.mxu0 %v1559_v53 }
 0x352   : > { %2735 = vmatprep.subr.bf16.mxu0 %v3793_v63 }
 0x3a2   : > { %v1038_v30 = vpop.xlane.xlu0 %1037 }
 0x3a3   : > { %2962 = vrcp.f32 %v1038_v30 }
 0x3a6   : > { %v1044_v35 = vpop.xlane.xlu0 %1043  ;;  %v1041_v43 = vpop.xlane.xlu1 %1040 }
 0x3a7   : > { %2964 = vrcp.f32 %v1041_v43 }
 0x3a8   : > { %2966 = vrcp.f32 %v1044_v35 }
 0x3aa   : > { %v1050_v37 = vpop.xlane.xlu0 %1049  ;;  %v1047_v20 = vpop.xlane.xlu1 %1046 }
 0x3ab   : > { %2968 = vrcp.f32 %v1047_v20 }
 0x3ac   : > { %2970 = vrcp.f32 %v1050_v37 }
 0x3ad   : > { %v2963_v8 = vpop.eup %2962 }
 0x3ae   : > { %v1056_v24 = vpop.xlane.xlu0 %1055  ;;  %v1053_v28 = vpop.xlane.xlu1 %1052  ;;  %v1064_v50 = vmul.f32 %v2963_v8, %v3700_v45 }
 0x3af   : > { %2972 = vrcp.f32 %v1056_v24 }
 0x3b0   : > { %2974 = vrcp.f32 %v1053_v28 }
 0x3b1   : > { %v2965_v46 = vpop.eup %2964 }
 0x3b2   : > { %v1065_v53 = vmul.f32 %v2965_v46, %v3706_v48  ;;  %v2967_v17 = vpop.eup %2966 }
 0x3b3   : > { %v1066_v43 = vmul.f32 %v2967_v17, %v3704_v47 }
 0x3b4   : > { %v1071_v27 = vpack.c.bf16 %v1065_v53, %v1064_v50 }
 0x3b5   : > { %v2969_v30 = vpop.eup %2968 }
 0x3b6   : > { %v1067_v35 = vmul.f32 %v2969_v30, %v3712_v51  ;;  %2663 = vmatprep.mubr.msk.bf16.mxu1 %vm993_vm3, %v1071_v27  ;;  %v2971_v37 = vpop.eup %2970 }
 0x3b7   : > { %v1068_v28 = vmul.f32 %v2971_v37, %v3714_v52  ;;  %v914_v52 = vpack.c.bf16 %v3613_v33, %v3613_v33 }
 0x3b8   : > { %v1072_v11 = vpack.c.bf16 %v1067_v35, %v1066_v43 }
 0x3b9   : > { %v2973_v20 = vpop.eup %2972 }
 0x3ba   : > { %v2975_v24 = vpop.eup %2974  ;;  %2664 = vmatmul.mubr.msk.bf16.vlgmr.msra.gmra.mrb[52].mxu1 %vm993_vm3, %v1072_v11  ;;  %v1070_v47 = vmul.f32 %v2973_v20, %v3722_v56  ;;  %v1324_v56 = vsel %vm1087_vm1, %v914_v52, 0 }
 0x3bb   : > { %v1069_v45 = vmul.f32 %v2975_v24, %v3720_v55  ;;  %2688 = vmatpush3.bf16.msra.mxu1 %v3594_v19 }
 0x3bc   : > { %2689 = vmatprep.subr.bf16.mxu1 %v3604_v25  ;;  %v1074_v51 = vpack.c.bf16 %v1070_v47, %v1070_v47 }
 0x3bd   : > { %v1073_v48 = vpack.c.bf16 %v1069_v45, %v1068_v28 }
 0x3bf   : > { %2667 = vmatprep.mubr.msk.bf16.mxu1 %vm993_vm3, %v1073_v48  ;;  %2690 = vmatpush3.bf16.msra.mxu1 %v3604_v25 }
 0x3c0   : > { %2691 = vmatprep.subr.bf16.mxu1 %v3611_v31 }
 0x3c2   : > { %v1274_v8 = vpop.xlane.xlu1 %1273  ;;  %2668 = vmatmul.mubr.msk.bf16.gmra.mrb[56].mxu1 %vm993_vm3, %v1074_v51 }
 0x3c3   : > { %2976 = vrcp.f32 %v1274_v8  ;;  %2692 = vmatpush3.bf16.msra.mxu1 %v3611_v31 }
 0x3c4   : > { %v1277_v19 = vpop.xlane.xlu0 %1276  ;;  %2772 = vmatprep.subr.msk.bf16.mxu1 %vm1087_vm1, %v914_v52 }
 0x3c5   : > { %2978 = vrcp.f32 %v1277_v19 }
 0x3c6   : > { %v1280_v55 = vpop.xlane.xlu1 %1279 }
 0x3c7   : > { %2980 = vrcp.f32 %v1280_v55  ;;  %2694 = vmatpush3.bf16.msra.mxu1 %v1324_v56 }
 0x3c8   : > { %v1283_v25 = vpop.xlane.xlu0 %1282  ;;  %2703 = vmatprep.subr.bf16.mxu1 %v3791_v6 }
 0x3c9   : > { %2982 = vrcp.f32 %v1283_v25 }
 0x3ca   : > { %v1286_v11 = vpop.xlane.xlu1 %1285 }
 0x3cb   : > { %2984 = vrcp.f32 %v1286_v11 }
 0x3cc   : > { %v1289_v33 = vpop.xlane.xlu0 %1288 }
 0x3cd   : > { %v2977_v46 = vpop.eup %2976  ;;  %2986 = vrcp.f32 %v1289_v33 }
 0x3ce   : > { %v1292_v50 = vpop.xlane.xlu1 %1291  ;;  %v1300_v53 = vmul.f32 %v2977_v46, %v3771_v40 }
 0x3cf   : > { %v2979_v31 = vpop.eup %2978  ;;  %2988 = vrcp.f32 %v1292_v50 }
 0x3d0   : > { %v1301_v17 = vmul.f32 %v2979_v31, %v3775_v49 }
 0x3d1   : > { %v2981_v27 = vpop.eup %2980 }
 0x3d2   : > { %v1307_v30 = vpack.c.bf16 %v1301_v17, %v1300_v53  ;;  %v1302_v35 = vmul.f32 %v2981_v27, %v3779_v54 }
 0x3d3   : > { %v2983_v43 = vpop.eup %2982 }
 0x3d4   : > { %v1303_v37 = vmul.f32 %v2983_v43, %v3783_v1  ;;  %2695 = vmatprep.mubr.msk.bf16.mxu1 %vm993_vm3, %v1307_v30 }
 0x3d5   : > { %v2985_v20 = vpop.eup %2984 }
 0x3d6   : > { %v1308_v24 = vpack.c.bf16 %v1303_v37, %v1302_v35  ;;  %v1304_v45 = vmul.f32 %v2985_v20, %v3797_v13 }
 0x3d7   : > { %v2987_v28 = vpop.eup %2986 }
 0x3d8   : > { %2696 = vmatmul.mubr.msk.bf16.vlgmr.msra.gmra.mrb[60].mxu1 %vm993_vm3, %v1308_v24  ;;  %v1305_v40 = vmul.f32 %v2987_v28, %v3803_v4 }
 0x3d9   : > { %v2989_v48 = vpop.eup %2988  ;;  %2704 = vmatpush3.bf16.xpose.msra.mxu1 %v3791_v6  ;;  %v911_v6 = vpack.c.bf16 %v3815_v41, %v3815_v41 }
 0x3da   : > { %v1309_v49 = vpack.c.bf16 %v1305_v40, %v1304_v45  ;;  %2705 = vmatprep.subr.bf16.mxu1 %v3795_v22  ;;  %v1306_v54 = vmul.f32 %v2989_v48, %v3807_v38 }
 0x3dc   : > { %2699 = vmatprep.mubr.msk.bf16.mxu1 %vm993_vm3, %v1309_v49  ;;  %v1310_v1 = vpack.c.bf16 %v1306_v54, %v1306_v54 }
 0x3e0   : > { %2700 = vmatmul.mubr.msk.bf16.gmra.mrb[64].mxu1 %vm993_vm3, %v1310_v1 }
 0x3e1   : > { %2706 = vmatpush3.bf16.xpose.msra.mxu1 %v3795_v22  ;;  %2711 = vmatprep.mubr.bf16.mxu1 %v871_v2  ;;  %v1794_v2 = vsel %vm1087_vm1, %v916_v62, 0 }
 0x3e2   : > { %2707 = vmatprep.subr.bf16.mxu1 %v3809_v39 }
 0x3e9   : > { %2708 = vmatpush3.bf16.xpose.msra.mxu1 %v3809_v39 }
 0x3ea   : > { %2709 = vmatprep.subr.bf16.mxu1 %v911_v6 }
 0x3f1   : > { %2710 = vmatpush3.bf16.xpose.msra.mxu1 %v911_v6 }
 0x3f2   : > { %2751 = vmatprep.subr.bf16.mxu1 %v3819_v14 }
 0x3f8   : > { %2712 = vmatmul.mubr.bf16.vlgmr.msra.gmra.mrb[68].mxu1 %v883_v16 }
 0x3f9   : > { %2715 = vmatprep.mubr.bf16.mxu1 %v895_v7  ;;  %2752 = vmatpush3.bf16.msra.mxu1 %v3819_v14 }
 0x3fa   : > { %2753 = vmatprep.subr.bf16.mxu1 %v3823_v57 }
 0x3fd   : > { %2754 = vmatpush3.bf16.msra.mxu1 %v3823_v57 }
 0x3fe   : > { %2755 = vmatprep.subr.bf16.mxu1 %v3825_v58 }
 0x400   : > { %2716 = vmatmul.mubr.bf16.gmra.mrb[72].mxu1 %v907_v59 }
 0x401   : > { %2756 = vmatpush3.bf16.msra.mxu1 %v3825_v58 }
 0x402   : > { %2774 = vmatprep.subr.msk.bf16.mxu1 %vm1087_vm1, %v916_v62 }
 0x405   : > { %2758 = vmatpush3.bf16.msra.mxu1 %v1794_v2 }
 0x48d   : > { %v3890_v15 = vpop.f32.mrb[52].mxu1 }
 0x48e   : > { %v3892_v21 = vpop.f32.mrb[53].mxu1 }
 0x48f   : > { %v3894_v26 = vpop.f32.mrb[54].mxu1 }
 0x490   : > { %v1156_v32 = vpack.c.bf16 %v3894_v26, %v3890_v15  ;;  %v3898_v36 = vpop.f32.mrb[55].mxu1  ;;  %v2932_v15 = vld [vmem:[#allocation7 + $0xf8] sm:$0xff]  }
 0x491   : > { %v1155_v16 = vpack.c.bf16 %v3898_v36, %v3892_v21  ;;  %v2931_v36 = vld [vmem:[#allocation7 + $0xb0] sm:$0xff]   ;;  %v2933_v26 = vld [vmem:[#allocation7 + $0xb8] sm:$0xff]  }
 0x495   : > { %v3902_v7 = vpop.f32.mrb[56].mxu1 }
 0x496   : > { %v3904_v22 = vpop.f32.mrb[57].mxu1  ;;  %v1158_v21 = vpack.c.bf16 %v3902_v7, %v3902_v7 }
 0x497   : > { %v2670_v13 = vpop.f32.mrb[58].mxu1 }
 0x498   : > { %v3906_v4 = vpop.f32.mrb[59].mxu1 }
 0x499   : > { %v1157_v38 = vpack.c.bf16 %v3906_v4, %v3904_v22 }
 0x4ab   : > { %v3910_v39 = vpop.f32.mrb[60].mxu1 }
 0x4ac   : > { %v3912_v41 = vpop.f32.mrb[61].mxu1 }
 0x4ad   : > { %v3914_v14 = vpop.f32.mrb[62].mxu1 }
 0x4ae   : > { %v1391_v57 = vpack.c.bf16 %v3914_v14, %v3910_v39  ;;  %v3918_v58 = vpop.f32.mrb[63].mxu1 }
 0x4af   : > { %v1390_v61 = vpack.c.bf16 %v3918_v58, %v3912_v41 }
 0x4b3   : > { %v3922_v47 = vpop.f32.mrb[64].mxu1 }
 0x4b4   : > { %v3924_v51 = vpop.f32.mrb[65].mxu1  ;;  %v1393_v41 = vpack.c.bf16 %v3922_v47, %v3922_v47 }
 0x4b5   : > { %v2702_v8 = vpop.f32.mrb[66].mxu1 }
 0x4b6   : > { %v3926_v52 = vpop.f32.mrb[67].mxu1 }
 0x4b7   : > { %v1392_v19 = vpack.c.bf16 %v3926_v52, %v3924_v51 }
 0x4cb   : > { %v2713_v55 = vpop.f32.mrb[68].mxu1 }
 0x4cc   : > { %v1428_v56 = vpop.f32.mrb[69].mxu1  ;;  %v1460_v50 = vsel %vm919_vm2, %v2713_v55, -1e+30 }
 0x4cd   : > { %v1458_v25 = vsel %vm919_vm2, %v1428_v56, -1e+30  ;;  %v2714_v11 = vpop.f32.mrb[70].mxu1  ;;  %v1471_v27 = vsel %vm993_vm3, %v1460_v50, -inf }
 0x4ce   : > { %v1431_v33 = vpop.f32.mrb[71].mxu1  ;;  %v1465_v46 = vsel %vm993_vm3, %v1458_v25, -inf  ;;  %v1461_v17 = vsel %vm919_vm2, %v2714_v11, -1e+30 }
 0x4cf   : > { %v1459_v31 = vsel %vm919_vm2, %v1431_v33, -1e+30  ;;  %1466 = vmax.xlane.f32.xlu0 %v1465_v46  ;;  %v1474_v35 = vsel %vm993_vm3, %v1461_v17, -inf }
 0x4d0   : > { %v1468_v53 = vsel %vm993_vm3, %v1459_v31, -inf }
 0x4d1   : > { %1469 = vmax.xlane.f32.xlu1 %v1468_v53 }
 0x4d3   : > { %1472 = vmax.xlane.f32.xlu0 %v1471_v27  ;;  %v2717_v30 = vpop.f32.mrb[72].mxu1 }
 0x4d4   : > { %v1444_v43 = vpop.f32.mrb[73].mxu1  ;;  %v1464_v45 = vsel %vm919_vm2, %v2717_v30, -1e+30 }
 0x4d5   : > { %v1462_v37 = vsel %vm919_vm2, %v1444_v43, -1e+30  ;;  %1475 = vmax.xlane.f32.xlu1 %v1474_v35  ;;  %v2718_v20 = vpop.f32.mrb[74].mxu1  ;;  %v1483_v49 = vsel %vm993_vm3, %v1464_v45, -inf }
 0x4d6   : > { %v1447_v24 = vpop.f32.mrb[75].mxu1  ;;  %v1477_v28 = vsel %vm993_vm3, %v1462_v37, -inf }
 0x4d7   : > { %v1463_v40 = vsel %vm919_vm2, %v1447_v24, -1e+30  ;;  %1478 = vmax.xlane.f32.xlu0 %v1477_v28 }
 0x4d8   : > { %v1480_v48 = vsel %vm993_vm3, %v1463_v40, -inf }
 0x4d9   : > { %1481 = vmax.xlane.f32.xlu1 %v1480_v48 }
 0x4db   : > { %1484 = vmax.xlane.f32.xlu0 %v1483_v49 }
 0x55c   : > { %v1467_v54 = vpop.xlane.xlu0 %1466 }
 0x55d   : > { %v1486_v1 = vsub.f32 %v1458_v25, %v1467_v54 }
 0x55e   : > { %v1470_v6 = vpop.xlane.xlu1 %1469 }
 0x55f   : > { %v1493_v59 = vmul.f32 1.442695, %v1486_v1  ;;  %v1487_v62 = vsub.f32 %v1459_v31, %v1470_v6 }
 0x560   : > { %v1473_v2 = vpop.xlane.xlu0 %1472 }
 0x561   : > { %2990 = vpow2.f32 %v1493_v59  ;;  %v1495_v13 = vmul.f32 1.442695, %v1487_v62  ;;  %v1488_v8 = vsub.f32 %v1460_v50, %v1473_v2 }
 0x562   : > { %v1476_v55 = vpop.xlane.xlu1 %1475 }
 0x563   : > { %2992 = vpow2.f32 %v1495_v13  ;;  %v1497_v56 = vmul.f32 1.442695, %v1488_v8  ;;  %v1489_v11 = vsub.f32 %v1461_v17, %v1476_v55 }
 0x564   : > { %v1479_v33 = vpop.xlane.xlu0 %1478 }
 0x565   : > { %2994 = vpow2.f32 %v1497_v56  ;;  %v1499_v46 = vmul.f32 1.442695, %v1489_v11  ;;  %v1490_v53 = vsub.f32 %v1462_v37, %v1479_v33 }
 0x566   : > { %v1482_v27 = vpop.xlane.xlu1 %1481 }
 0x567   : > { %2996 = vpow2.f32 %v1499_v46  ;;  %v1501_v30 = vmul.f32 1.442695, %v1490_v53  ;;  %v1491_v43 = vsub.f32 %v1463_v40, %v1482_v27 }
 0x568   : > { %v1485_v25 = vpop.xlane.xlu0 %1484 }
 0x569   : > { %2998 = vpow2.f32 %v1501_v30  ;;  %v1503_v35 = vmul.f32 1.442695, %v1491_v43  ;;  %v1492_v31 = vsub.f32 %v1464_v45, %v1485_v25 }
 0x56b   : > { %v2991_v20 = vpop.eup %2990  ;;  %3000 = vpow2.f32 %v1503_v35  ;;  %v1505_v24 = vmul.f32 1.442695, %v1492_v31 }
 0x56c   : > { %v1507_v50 = vsel %vm993_vm3, %v2991_v20, 0.0 }
 0x56d   : > { %v2993_v28 = vpop.eup %2992  ;;  %3002 = vpow2.f32 %v1505_v24  ;;  %1508 = vadd.xlane.f32.xlu1 %v1507_v50 }
 0x56e   : > { %v1510_v17 = vsel %vm993_vm3, %v2993_v28, 0.0 }
 0x56f   : > { %v2995_v48 = vpop.eup %2994  ;;  %1511 = vadd.xlane.f32.xlu0 %v1510_v17 }
 0x570   : > { %v1513_v37 = vsel %vm993_vm3, %v2995_v48, 0.0 }
 0x571   : > { %v2997_v49 = vpop.eup %2996  ;;  %1514 = vadd.xlane.f32.xlu1 %v1513_v37 }
 0x572   : > { %v1516_v40 = vsel %vm993_vm3, %v2997_v49, 0.0 }
 0x573   : > { %v2999_v54 = vpop.eup %2998  ;;  %1517 = vadd.xlane.f32.xlu0 %v1516_v40 }
 0x574   : > { %v1519_v45 = vsel %vm993_vm3, %v2999_v54, 0.0 }
 0x575   : > { %v3001_v1 = vpop.eup %3000  ;;  %1520 = vadd.xlane.f32.xlu1 %v1519_v45 }
 0x576   : > { %v1522_v6 = vsel %vm993_vm3, %v3001_v1, 0.0 }
 0x577   : > { %v3003_v59 = vpop.eup %3002  ;;  %1523 = vadd.xlane.f32.xlu0 %v1522_v6 }
 0x578   : > { %v1525_v62 = vsel %vm993_vm3, %v3003_v59, 0.0 }
 0x579   : > { %1526 = vadd.xlane.f32.xlu1 %v1525_v62 }
 0x5fa   : > { %v1509_v2 = vpop.xlane.xlu1 %1508 }
 0x5fb   : > { %3004 = vrcp.f32 %v1509_v2 }
 0x5fc   : > { %v1512_v13 = vpop.xlane.xlu0 %1511 }
 0x5fd   : > { %3006 = vrcp.f32 %v1512_v13 }
 0x5fe   : > { %v1515_v8 = vpop.xlane.xlu1 %1514 }
 0x5ff   : > { %3008 = vrcp.f32 %v1515_v8 }
 0x600   : > { %v1518_v55 = vpop.xlane.xlu0 %1517 }
 0x601   : > { %3010 = vrcp.f32 %v1518_v55 }
 0x602   : > { %v1521_v56 = vpop.xlane.xlu1 %1520 }
 0x603   : > { %3012 = vrcp.f32 %v1521_v56 }
 0x604   : > { %v1524_v11 = vpop.xlane.xlu0 %1523 }
 0x605   : > { %v3005_v33 = vpop.eup %3004  ;;  %3014 = vrcp.f32 %v1524_v11 }
 0x606   : > { %v1527_v46 = vpop.xlane.xlu1 %1526  ;;  %v1535_v27 = vmul.f32 %v3005_v33, %v2991_v20 }
 0x607   : > { %v3007_v53 = vpop.eup %3006  ;;  %3016 = vrcp.f32 %v1527_v46 }
 0x608   : > { %v1536_v30 = vmul.f32 %v3007_v53, %v2993_v28 }
 0x609   : > { %v3009_v43 = vpop.eup %3008 }
 0x60a   : > { %v1542_v25 = vpack.c.bf16 %v1536_v30, %v1535_v27  ;;  %v1537_v31 = vmul.f32 %v3009_v43, %v2995_v48 }
 0x60b   : > { %v3011_v35 = vpop.eup %3010 }
 0x60c   : > { %v1538_v24 = vmul.f32 %v3011_v35, %v2997_v49  ;;  %2727 = vmatprep.mubr.msk.bf16.mxu0 %vm993_vm3, %v1542_v25 }
 0x60d   : > { %v3013_v50 = vpop.eup %3012 }
 0x60e   : > { %v1543_v17 = vpack.c.bf16 %v1538_v24, %v1537_v31  ;;  %v1539_v40 = vmul.f32 %v3013_v50, %v2999_v54 }
 0x60f   : > { %v3015_v37 = vpop.eup %3014 }
 0x610   : > { %2728 = vmatmul.mubr.msk.bf16.vlgmr.msra.gmra.mrb[60].mxu0 %vm993_vm3, %v1543_v17  ;;  %v1540_v45 = vmul.f32 %v3015_v37, %v3001_v1 }
 0x611   : > { %v3017_v6 = vpop.eup %3016  ;;  %2736 = vmatpush3.bf16.xpose.msra.mxu0 %v3793_v63  ;;  %v912_v63 = vpack.c.bf16 %v3817_v29, %v3817_v29 }
 0x612   : > { %2737 = vmatprep.subr.bf16.mxu0 %v3799_v5  ;;  %v1544_v20 = vpack.c.bf16 %v1540_v45, %v1539_v40  ;;  %v1541_v28 = vmul.f32 %v3017_v6, %v3003_v59 }
 0x614   : > { %2731 = vmatprep.mubr.msk.bf16.mxu0 %vm993_vm3, %v1544_v20  ;;  %v1545_v48 = vpack.c.bf16 %v1541_v28, %v1541_v28 }
 0x618   : > { %2732 = vmatmul.mubr.msk.bf16.gmra.mrb[64].mxu0 %vm993_vm3, %v1545_v48 }
 0x619   : > { %2738 = vmatpush3.bf16.xpose.msra.mxu0 %v3799_v5  ;;  %2743 = vmatprep.mubr.bf16.mxu0 %v872_v10  ;;  %v4183_v5 = vpack.c.bf16 %v3759_v34, %v3754_v0 }
 0x61a   : > { %2739 = vmatprep.subr.bf16.mxu0 %v3813_v12 }
 0x621   : > { %2740 = vmatpush3.bf16.xpose.msra.mxu0 %v3813_v12 }
 0x622   : > { %2741 = vmatprep.subr.bf16.mxu0 %v912_v63 }
 0x629   : > { %2742 = vmatpush3.bf16.xpose.msra.mxu0 %v912_v63 }
 0x630   : > { %2744 = vmatmul.mubr.bf16.vlgmr.msra.gmra.mrb[68].mxu0 %v884_v44 }
 0x631   : > { %2747 = vmatprep.mubr.bf16.mxu0 %v4183_v5 }
 0x638   : > { %2748 = vmatmul.mubr.bf16.gmra.mrb[72].mxu0 %v908_v60 }
 0x6e3   : > { %v3980_v3 = vpop.f32.mrb[60].mxu0 }
 0x6e4   : > { %v3982_v10 = vpop.f32.mrb[61].mxu0 }
 0x6e5   : > { %v3984_v29 = vpop.f32.mrb[62].mxu0 }
 0x6e6   : > { %v1626_v12 = vpack.c.bf16 %v3984_v29, %v3980_v3  ;;  %v3988_v49 = vpop.f32.mrb[63].mxu0 }
 0x6e7   : > { %v1625_v18 = vpack.c.bf16 %v3988_v49, %v3982_v10 }
 0x6eb   : > { %v3992_v23 = vpop.f32.mrb[64].mxu0 }
 0x6ec   : > { %v3994_v0 = vpop.f32.mrb[65].mxu0  ;;  %v1628_v51 = vpack.c.bf16 %v3992_v23, %v3992_v23 }
 0x6ed   : > { %v2734_v34 = vpop.f32.mrb[66].mxu0 }
 0x6ee   : > { %v3996_v9 = vpop.f32.mrb[67].mxu0 }
 0x6ef   : > { %v1627_v44 = vpack.c.bf16 %v3996_v9, %v3994_v0 }
 0x703   : > { %v2745_v54 = vpop.f32.mrb[68].mxu0 }
 0x704   : > { %v1663_v1 = vpop.f32.mrb[69].mxu0  ;;  %v1695_v8 = vsel %vm919_vm2, %v2745_v54, -1e+30 }
 0x705   : > { %v1693_v59 = vsel %vm919_vm2, %v1663_v1, -1e+30  ;;  %v2746_v62 = vpop.f32.mrb[70].mxu0  ;;  %v1706_v33 = vsel %vm993_vm3, %v1695_v8, -inf }
 0x706   : > { %v1666_v2 = vpop.f32.mrb[71].mxu0  ;;  %v1700_v13 = vsel %vm993_vm3, %v1693_v59, -inf  ;;  %v1696_v11 = vsel %vm919_vm2, %v2746_v62, -1e+30 }
 0x707   : > { %v1694_v55 = vsel %vm919_vm2, %v1666_v2, -1e+30  ;;  %1701 = vmax.xlane.f32.xlu0 %v1700_v13  ;;  %v1709_v27 = vsel %vm993_vm3, %v1696_v11, -inf }
 0x708   : > { %v1703_v56 = vsel %vm993_vm3, %v1694_v55, -inf }
 0x709   : > { %1704 = vmax.xlane.f32.xlu1 %v1703_v56 }
 0x70b   : > { %1707 = vmax.xlane.f32.xlu0 %v1706_v33  ;;  %v2749_v46 = vpop.f32.mrb[72].mxu0 }
 0x70c   : > { %v1679_v53 = vpop.f32.mrb[73].mxu0  ;;  %v1699_v31 = vsel %vm919_vm2, %v2749_v46, -1e+30 }
 0x70d   : > { %v1697_v30 = vsel %vm919_vm2, %v1679_v53, -1e+30  ;;  %1710 = vmax.xlane.f32.xlu1 %v1709_v27  ;;  %v2750_v43 = vpop.f32.mrb[74].mxu0  ;;  %v1718_v17 = vsel %vm993_vm3, %v1699_v31, -inf }
 0x70e   : > { %v1682_v25 = vpop.f32.mrb[75].mxu0  ;;  %v1712_v35 = vsel %vm993_vm3, %v1697_v30, -inf }
 0x70f   : > { %v1698_v24 = vsel %vm919_vm2, %v1682_v25, -1e+30  ;;  %1713 = vmax.xlane.f32.xlu0 %v1712_v35 }
 0x710   : > { %v1715_v50 = vsel %vm993_vm3, %v1698_v24, -inf }
 0x711   : > { %1716 = vmax.xlane.f32.xlu1 %v1715_v50 }
 0x713   : > { %1719 = vmax.xlane.f32.xlu0 %v1718_v17 }
 0x794   : > { %v1702_v37 = vpop.xlane.xlu0 %1701 }
 0x795   : > { %v1721_v40 = vsub.f32 %v1693_v59, %v1702_v37 }
 0x796   : > { %v1705_v45 = vpop.xlane.xlu1 %1704 }
 0x797   : > { %v1728_v6 = vmul.f32 1.442695, %v1721_v40  ;;  %v1722_v20 = vsub.f32 %v1694_v55, %v1705_v45  ;;  %v2902_v40 = vld [vmem:[#allocation7 + $0x40] sm:$0xff]  }
 0x798   : > { %v1708_v28 = vpop.xlane.xlu0 %1707  ;;  %2559 = vmatprep.subr.bf16.mxu1 %v2902_v40  ;;  %v2918_v45 = vld [vmem:[#allocation7 + $0xc0] sm:$0xff]  }
 0x799   : > { %3018 = vpow2.f32 %v1728_v6  ;;  %v1730_v48 = vmul.f32 1.442695, %v1722_v20  ;;  %v1723_v63 = vsub.f32 %v1695_v8, %v1708_v28  ;;  %v2919_v6 = vld [vmem:[#allocation7 + $0x80] sm:$0xff]   ;;  %v2920_v20 = vld [vmem:[#allocation7 + $0xc8] sm:$0xff]   ;;  %2599 = vmatprep.subr.bf16.mxu0 %v2918_v45 }
 0x79a   : > { %v1711_v5 = vpop.xlane.xlu1 %1710  ;;  %2600 = vmatpush3.bf16.msra.mxu0 %v2919_v6  ;;  %v2921_v28 = vld [vmem:[#allocation7 + $0x88] sm:$0xff]  }
 0x79b   : > { %3020 = vpow2.f32 %v1730_v48  ;;  %v1732_v42 = vmul.f32 1.442695, %v1723_v63  ;;  %v1724_v60 = vsub.f32 %v1696_v11, %v1711_v5  ;;  %2601 = vmatprep.subr.bf16.mxu0 %v2920_v20  ;;  %v2922_v48 = vld [vmem:[#allocation7 + $0xd0] sm:$0xff]   ;;  %v2924_v5 = vld [vmem:[#allocation7 + $0xd8] sm:$0xff]  }
 0x79c   : > { %v1714_v34 = vpop.xlane.xlu0 %1713  ;;  %v2923_v63 = vld [vmem:[#allocation7 + $0x90] sm:$0xff]  }
 0x79d   : > { %3022 = vpow2.f32 %v1732_v42  ;;  %v1734_v54 = vmul.f32 1.442695, %v1724_v60  ;;  %v1725_v1 = vsub.f32 %v1697_v30, %v1714_v34  ;;  %v2925_v42 = vld [vmem:[#allocation7 + $0x98] sm:$0xff]   ;;  %v2926_v60 = vld [vmem:[#allocation7 + $0xe0] sm:$0xff]  }
 0x79e   : > { %v1717_v62 = vpop.xlane.xlu1 %1716  ;;  %2602 = vmatpush3.bf16.msra.mxu0 %v2921_v28  ;;  %v2927_v34 = vld [vmem:[#allocation7 + $0xa0] sm:$0xff]  }
 0x79f   : > { %3024 = vpow2.f32 %v1734_v54  ;;  %v1736_v2 = vmul.f32 1.442695, %v1725_v1  ;;  %v1726_v13 = vsub.f32 %v1698_v24, %v1717_v62  ;;  %2603 = vmatprep.subr.bf16.mxu0 %v2922_v48  ;;  %v2928_v54 = vld [vmem:[#allocation7 + $0xe8] sm:$0xff]   ;;  %v2930_v62 = vld [vmem:[#allocation7 + $0xf0] sm:$0xff]   ;;  %v2903_v28 = vld [vmem:[#allocation7] sm:$0xff]  }
 0x7a0   : > { %v1720_v59 = vpop.xlane.xlu0 %1719  ;;  %v2929_v1 = vld [vmem:[#allocation7 + $0xa8] sm:$0xff]  }
 0x7a1   : > { %3026 = vpow2.f32 %v1736_v2  ;;  %v1738_v56 = vmul.f32 1.442695, %v1726_v13  ;;  %v1727_v55 = vsub.f32 %v1699_v31, %v1720_v59 }
 0x7a2   : > { %2604 = vmatpush3.bf16.msra.mxu0 %v2923_v63  ;;  %v2904_v63 = vld [vmem:[#allocation7 + $0x48] sm:$0xff]  }
 0x7a3   : > { %v4021_v33 = vpop.eup %3018  ;;  %3028 = vpow2.f32 %v1738_v56  ;;  %v1740_v8 = vmul.f32 1.442695, %v1727_v55  ;;  %2605 = vmatprep.subr.bf16.mxu0 %v2924_v5 }
 0x7a4   : > { %v1742_v46 = vsel %vm993_vm3, %v4021_v33, 0.0 }
 0x7a5   : > { %v4025_v11 = vpop.eup %3020  ;;  %3030 = vpow2.f32 %v1740_v8  ;;  %1743 = vadd.xlane.f32.xlu1 %v1742_v46 }
 0x7a6   : > { %v1745_v53 = vsel %vm993_vm3, %v4025_v11, 0.0  ;;  %2606 = vmatpush3.bf16.msra.mxu0 %v2925_v42 }
 0x7a7   : > { %v4029_v27 = vpop.eup %3022  ;;  %1746 = vadd.xlane.f32.xlu0 %v1745_v53  ;;  %2607 = vmatprep.subr.bf16.mxu0 %v2926_v60  ;;  %v2905_v60 = vld [vmem:[#allocation7 + $0x8] sm:$0xff]  }
 0x7a8   : > { %v1748_v30 = vsel %vm993_vm3, %v4029_v27, 0.0 }
 0x7a9   : > { %v4033_v43 = vpop.eup %3024  ;;  %1749 = vadd.xlane.f32.xlu1 %v1748_v30 }
 0x7aa   : > { %v1751_v25 = vsel %vm993_vm3, %v4033_v43, 0.0  ;;  %2608 = vmatpush3.bf16.msra.mxu0 %v2927_v34  ;;  %v2906_v34 = vld [vmem:[#allocation7 + $0x50] sm:$0xff]  }
 0x7ab   : > { %v4037_v35 = vpop.eup %3026  ;;  %1752 = vadd.xlane.f32.xlu0 %v1751_v25  ;;  %2609 = vmatprep.subr.bf16.mxu0 %v2928_v54  ;;  %v2907_v54 = vld [vmem:[#allocation7 + $0x10] sm:$0xff]  }
 0x7ac   : > { %v1754_v31 = vsel %vm993_vm3, %v4037_v35, 0.0 }
 0x7ad   : > { %v4041_v24 = vpop.eup %3028  ;;  %1755 = vadd.xlane.f32.xlu1 %v1754_v31 }
 0x7ae   : > { %v1757_v50 = vsel %vm993_vm3, %v4041_v24, 0.0  ;;  %2610 = vmatpush3.bf16.msra.mxu0 %v2929_v1 }
 0x7af   : > { %v4045_v17 = vpop.eup %3030  ;;  %1758 = vadd.xlane.f32.xlu0 %v1757_v50  ;;  %2611 = vmatprep.subr.bf16.mxu0 %v2930_v62  ;;  %v2908_v62 = vld [vmem:[#allocation7 + $0x58] sm:$0xff]  }
 0x7b0   : > { %v1760_v37 = vsel %vm993_vm3, %v4045_v17, 0.0 }
 0x7b1   : > { %1761 = vadd.xlane.f32.xlu1 %v1760_v37 }
 0x7b2   : > { %2612 = vmatpush3.bf16.msra.mxu0 %v2931_v36 }
 0x7b3   : > { %2613 = vmatprep.subr.bf16.mxu0 %v2932_v15 }
 0x7b6   : > { %2614 = vmatpush3.bf16.msra.mxu0 %v2933_v26 }
 0x832   : > { %v1744_v2 = vpop.xlane.xlu1 %1743 }
 0x833   : > { %3032 = vrcp.f32 %v1744_v2  ;;  %v2911_v2 = vld [vmem:[#allocation7 + $0x20] sm:$0xff]  }
 0x834   : > { %v1747_v13 = vpop.xlane.xlu0 %1746 }
 0x835   : > { %3034 = vrcp.f32 %v1747_v13  ;;  %v2913_v13 = vld [vmem:[#allocation7 + $0x28] sm:$0xff]  }
 0x836   : > { %v1750_v59 = vpop.xlane.xlu1 %1749 }
 0x837   : > { %3036 = vrcp.f32 %v1750_v59  ;;  %v2914_v59 = vld [vmem:[#allocation7 + $0x70] sm:$0xff]  }
 0x838   : > { %v1753_v56 = vpop.xlane.xlu0 %1752 }
 0x839   : > { %3038 = vrcp.f32 %v1753_v56  ;;  %v2915_v56 = vld [vmem:[#allocation7 + $0x30] sm:$0xff]  }
 0x83a   : > { %v1756_v55 = vpop.xlane.xlu1 %1755 }
 0x83b   : > { %3040 = vrcp.f32 %v1756_v55  ;;  %v2916_v55 = vld [vmem:[#allocation7 + $0x78] sm:$0xff]  }
 0x83c   : > { %v1759_v8 = vpop.xlane.xlu0 %1758 }
 0x83d   : > { %v3033_v46 = vpop.eup %3032  ;;  %3042 = vrcp.f32 %v1759_v8  ;;  %v2917_v8 = vld [vmem:[#allocation7 + $0x38] sm:$0xff]  }
 0x83e   : > { %v1762_v53 = vpop.xlane.xlu1 %1761  ;;  %v1770_v25 = vmul.f32 %v3033_v46, %v4021_v33 }
 0x83f   : > { %v3035_v30 = vpop.eup %3034  ;;  %3044 = vrcp.f32 %v1762_v53 }
 0x840   : > { %v1771_v31 = vmul.f32 %v3035_v30, %v4025_v11 }
 0x841   : > { %v3037_v50 = vpop.eup %3036 }
 0x842   : > { %v1777_v37 = vpack.c.bf16 %v1771_v31, %v1770_v25  ;;  %v1772_v45 = vmul.f32 %v3037_v50, %v4029_v27 }
 0x843   : > { %v3039_v40 = vpop.eup %3038 }
 0x844   : > { %v1773_v6 = vmul.f32 %v3039_v40, %v4033_v43  ;;  %2759 = vmatprep.mubr.msk.bf16.mxu1 %vm993_vm3, %v1777_v37 }
 0x845   : > { %v3041_v20 = vpop.eup %3040 }
 0x846   : > { %v1778_v48 = vpack.c.bf16 %v1773_v6, %v1772_v45  ;;  %v1774_v33 = vmul.f32 %v3041_v20, %v4037_v35  ;;  %v2909_v35 = vld [vmem:[#allocation7 + $0x18] sm:$0xff]  }
 0x847   : > { %v3043_v5 = vpop.eup %3042 }
 0x848   : > { %2760 = vmatmul.mubr.msk.bf16.vlgmr.msra.gmra.mrb[76].mxu1 %vm993_vm3, %v1778_v48  ;;  %v1775_v11 = vmul.f32 %v3043_v5, %v4041_v24  ;;  %v2910_v24 = vld [vmem:[#allocation7 + $0x60] sm:$0xff]  }
 0x849   : > { %v3045_v42 = vpop.eup %3044  ;;  %2560 = vmatpush3.bf16.msra.mxu1 %v2903_v28  ;;  %v2457_v28 = vld [vmem:[#allocation8] ss:$0 sm:$0xff] }
 0x84a   : > { %2561 = vmatprep.subr.bf16.mxu1 %v2904_v63  ;;  %v1779_v27 = vpack.c.bf16 %v1775_v11, %v1774_v33  ;;  %v1776_v43 = vmul.f32 %v3045_v42, %v4045_v17  ;;  %v2912_v17 = vld [vmem:[#allocation7 + $0x68] sm:$0xff]  }
 0x84c   : > { %2763 = vmatprep.mubr.msk.bf16.mxu1 %vm993_vm3, %v1779_v27  ;;  %v1780_v1 = vpack.c.bf16 %v1776_v43, %v1776_v43 }
 0x84d   : > { %2562 = vmatpush3.bf16.msra.mxu1 %v2905_v60 }
 0x84e   : > { %2563 = vmatprep.subr.bf16.mxu1 %v2906_v34 }
 0x850   : > { %2764 = vmatmul.mubr.msk.bf16.gmra.mrb[80].mxu1 %vm993_vm3, %v1780_v1 }
 0x851   : > { %2564 = vmatpush3.bf16.msra.mxu1 %v2907_v54  ;;  %2159 = vmatprep.mubr.bf16.mxu1 %v1390_v61 }
 0x852   : > { %2565 = vmatprep.subr.bf16.mxu1 %v2908_v62 }
 0x855   : > { %2566 = vmatpush3.bf16.msra.mxu1 %v2909_v35 }
 0x856   : > { %2567 = vmatprep.subr.bf16.mxu1 %v2910_v24 }
 0x859   : > { %2568 = vmatpush3.bf16.msra.mxu1 %v2911_v2 }
 0x85a   : > { %2569 = vmatprep.subr.bf16.mxu1 %v2912_v17 }
 0x85d   : > { %2570 = vmatpush3.bf16.msra.mxu1 %v2913_v13 }
 0x85e   : > { %2571 = vmatprep.subr.bf16.mxu1 %v2914_v59 }
 0x861   : > { %2572 = vmatpush3.bf16.msra.mxu1 %v2915_v56 }
 0x862   : > { %2573 = vmatprep.subr.bf16.mxu1 %v2916_v55 }
 0x865   : > { %2574 = vmatpush3.bf16.msra.mxu1 %v2917_v8 }
 0x868   : > { %2160 = vmatmul.mubr.bf16.vlgmr.msra.gmra.mrb[84].mxu1 %v1155_v16 }
 0x869   : > { %2167 = vmatprep.mubr.bf16.mxu1 %v1391_v57 }
 0x870   : > { %2168 = vmatmul.mubr.bf16.gmra.mrb[88].mxu1 %v1156_v32 }
 0x871   : > { %2175 = vmatprep.mubr.bf16.mxu1 %v1392_v19 }
 0x878   : > { %2176 = vmatmul.mubr.bf16.gmra.mrb[92].mxu1 %v1157_v38 }
 0x879   : > { %2183 = vmatprep.mubr.bf16.mxu1 %v1393_v41 }
 0x880   : > { %2184 = vmatmul.mubr.bf16.gmra.mrb[96].mxu1 %v1158_v21 }
 0x91b   : > { %v2761_v32 = vpop.f32.mrb[76].mxu1 }
 0x91c   : > { %v1830_v16 = vpop.f32.mrb[77].mxu1 }
 0x91d   : > { %v2762_v39 = vpop.f32.mrb[78].mxu1 }
 0x91e   : > { %v1861_v14 = vpack.c.bf16 %v2762_v39, %v2761_v32  ;;  %v1833_v57 = vpop.f32.mrb[79].mxu1 }
 0x91f   : > { %v1860_v58 = vpack.c.bf16 %v1833_v57, %v1830_v16 }
 0x921   : > { %2223 = vmatprep.mubr.bf16.mxu0 %v1860_v58 }
 0x922   : > { %2224 = vmatmul.mubr.bf16.vlgmr.msra.gmra.mrb[76].mxu0 %v1625_v18 }
 0x923   : > { %v2765_v22 = vpop.f32.mrb[80].mxu1  ;;  %2231 = vmatprep.mubr.bf16.mxu0 %v1861_v14 }
 0x924   : > { %v1846_v7 = vpop.f32.mrb[81].mxu1  ;;  %v1863_v47 = vpack.c.bf16 %v2765_v22, %v2765_v22 }
 0x925   : > { %v2766_v4 = vpop.f32.mrb[82].mxu1 }
 0x926   : > { %v1849_v38 = vpop.f32.mrb[83].mxu1 }
 0x927   : > { %v1862_v61 = vpack.c.bf16 %v1849_v38, %v1846_v7 }
 0x92a   : > { %2232 = vmatmul.mubr.bf16.gmra.mrb[80].mxu0 %v1626_v12 }
 0x92b   : > { %2239 = vmatprep.mubr.bf16.mxu0 %v1862_v61 }
 0x932   : > { %2240 = vmatmul.mubr.bf16.gmra.mrb[84].mxu0 %v1627_v44 }
 0x933   : > { %2247 = vmatprep.mubr.bf16.mxu0 %v1863_v47 }
 0x93a   : > { %2248 = vmatmul.mubr.bf16.gmra.mrb[88].mxu0 %v1628_v51 }
 0x93b   : > { %v2575_v52 = vpop.f32.mrb[84].mxu1 }
 0x93c   : > { %v2576_v19 = vpop.f32.mrb[85].mxu1 }
 0x93d   : > { %v2577_v10 = vadd.f32 %v2576_v19, %v2575_v52  ;;  %v2578_v49 = vpop.f32.mrb[86].mxu1 }
 0x93e   : > { %v2579_v18 = vpop.f32.mrb[87].mxu1 }
 0x93f   : > { %v2580_v46 = vadd.f32 %v2579_v18, %v2578_v49  ;;  %v2162_v5 = vadd.f32 %v2577_v10, %v2457_v28 }
 0x941   : > { %v2165_v60 = vadd.f32 %v2580_v46, %v2457_v28 }
 0x943   : > { %v2581_v53 = vpop.f32.mrb[88].mxu1 }
 0x944   : > { %v2582_v3 = vpop.f32.mrb[89].mxu1 }
 0x945   : > { %v2583_v29 = vadd.f32 %v2582_v3, %v2581_v53  ;;  %v2584_v12 = vpop.f32.mrb[90].mxu1 }
 0x946   : > { %v2585_v30 = vpop.f32.mrb[91].mxu1 }
 0x947   : > { %v2586_v25 = vadd.f32 %v2585_v30, %v2584_v12  ;;  %v2170_v62 = vadd.f32 %v2583_v29, %v2457_v28 }
 0x949   : > { %v2173_v17 = vadd.f32 %v2586_v25, %v2457_v28 }
 0x94b   : > { %v2587_v0 = vpop.f32.mrb[92].mxu1 }
 0x94c   : > { %v2588_v9 = vpop.f32.mrb[93].mxu1 }
 0x94d   : > { %v2589_v44 = vadd.f32 %v2588_v9, %v2587_v0  ;;  %v2590_v31 = vpop.f32.mrb[94].mxu1 }
 0x94e   : > { %v2591_v50 = vpop.f32.mrb[95].mxu1 }
 0x94f   : > { %v2592_v23 = vadd.f32 %v2591_v50, %v2590_v31  ;;  %v2178_v41 = vadd.f32 %v2589_v44, %v2457_v28 }
 0x951   : > { %v2181_v26 = vadd.f32 %v2592_v23, %v2457_v28 }
 0x953   : > { %v2593_v37 = vpop.f32.mrb[96].mxu1 }
 0x954   : > { %v2594_v40 = vpop.f32.mrb[97].mxu1 }
 0x955   : > { %v2595_v45 = vadd.f32 %v2594_v40, %v2593_v37  ;;  %v2596_v6 = vpop.f32.mrb[98].mxu1 }
 0x956   : > { %v2597_v20 = vpop.f32.mrb[99].mxu1 }
 0x957   : > { %v2186_v58 = vadd.f32 %v2595_v45, %v2457_v28 }
 0x9f5   : > { %v2615_v48 = vpop.f32.mrb[76].mxu0 }
 0x9f6   : > { %v2616_v63 = vpop.f32.mrb[77].mxu0 }
 0x9f7   : > { %v2617_v33 = vadd.f32 %v2616_v63, %v2615_v48  ;;  %v2618_v11 = vpop.f32.mrb[78].mxu0 }
 0x9f8   : > { %v2619_v42 = vpop.f32.mrb[79].mxu0 }
 0x9f9   : > { %v2226_v27 = vadd.f32 %v2617_v33, %v2162_v5  ;;  %v2620_v34 = vadd.f32 %v2619_v42, %v2618_v11 }
 0x9fb   : > { %2255 = vst.msk [vmem:[%s4094_s23] sm:$0xff] %vm430_vm0, %v2226_v27  ;;  %v2229_v43 = vadd.f32 %v2620_v34, %v2165_v60 }
 0x9fd   : > { %2256 = vst.msk [vmem:[%s4094_s23 + $0x8] sm:$0xff] %vm430_vm0, %v2229_v43  ;;  %v2621_v54 = vpop.f32.mrb[80].mxu0 }
 0x9fe   : > { %v2622_v1 = vpop.f32.mrb[81].mxu0 }
 0x9ff   : > { %v2623_v35 = vadd.f32 %v2622_v1, %v2621_v54  ;;  %v2624_v24 = vpop.f32.mrb[82].mxu0 }
 0xa00   : > { %v2625_v2 = vpop.f32.mrb[83].mxu0 }
 0xa01   : > { %v2234_v13 = vadd.f32 %v2623_v35, %v2170_v62  ;;  %v2626_v59 = vadd.f32 %v2625_v2, %v2624_v24 }
 0xa03   : > { %2257 = vst.msk [vmem:[%s4094_s23 + $0x10] sm:$0xff] %vm430_vm0, %v2234_v13  ;;  %v2237_v56 = vadd.f32 %v2626_v59, %v2173_v17 }
 0xa05   : > { %2258 = vst.msk [vmem:[%s4094_s23 + $0x18] sm:$0xff] %vm430_vm0, %v2237_v56  ;;  %v2627_v55 = vpop.f32.mrb[84].mxu0 }
 0xa06   : > { %v2628_v8 = vpop.f32.mrb[85].mxu0 }
 0xa07   : > { %v2629_v21 = vadd.f32 %v2628_v8, %v2627_v55  ;;  %v2630_v36 = vpop.f32.mrb[86].mxu0 }
 0xa08   : > { %v2631_v15 = vpop.f32.mrb[87].mxu0 }
 0xa09   : > { %v2242_v32 = vadd.f32 %v2629_v21, %v2178_v41  ;;  %v2632_v16 = vadd.f32 %v2631_v15, %v2630_v36 }
 0xa0b   : > { %2259 = vst.msk [vmem:[%s4094_s23 + $0x20] sm:$0xff] %vm430_vm0, %v2242_v32  ;;  %v2245_v39 = vadd.f32 %v2632_v16, %v2181_v26 }
 0xa0d   : > { %2260 = vst.msk [vmem:[%s4094_s23 + $0x28] sm:$0xff] %vm430_vm0, %v2245_v39  ;;  %v2633_v14 = vpop.f32.mrb[88].mxu0 }
 0xa0e   : > { %v2634_v57 = vpop.f32.mrb[89].mxu0 }
 0xa0f   : > { %v2635_v22 = vadd.f32 %v2634_v57, %v2633_v14  ;;  %v2636_v7 = vpop.f32.mrb[90].mxu0 }
 0xa10   : > { %v2637_v4 = vpop.f32.mrb[91].mxu0 }
 0xa11   : > { %v2250_v38 = vadd.f32 %v2635_v22, %v2186_v58 }
 0xa13   : > { %2261 = vst.msk [vmem:[%s4094_s23 + $0x30] sm:$0xff] %vm430_vm0, %v2250_v38 }
 0xa14   : > { %3173 = shalt.err (!%p3170_p4)
}
 0xa15   : > { %s3174_s28 = scalar_lea.hbm %s4113_s25, 896  ;;  %s3178_s29 = scalar_lea.hbm %s4165_s4, 1792 }
 0xa16   : > { %p3175_p9 = scmp.ne.s32.totalorder %s4113_s25, %s3174_s28  ;;  %p3179_p8 = scmp.lt.u32.totalorder %s4113_s25, %s4165_s4 }
 0xa17   : > { %p3180_p13 = scmp.lt.u32.totalorder %s3178_s29, %s3174_s28  ;;  %p3182_p10 = scmp.lt.u32.totalorder %s3174_s28, %s4113_s25 }
 0xa18   : > { %p3176_p0 = pnand %p3175_p9, %p3418_p5 }
 0xa19   : > { %p3181_p6 = por %p3180_p13, %p3179_p8 }
 0xa1a   : > { %p3177_p7 = pneg %p3176_p0 }
 0xa1b   : > { %p3183_p3 = por %p3182_p10, %p3181_p6 }
 0xa1d   : > { %p3184_p11 = pnand %p3183_p3, %p3177_p7 }
 0xa1f   : > { %3187 = shalt.err (!%p3184_p11)
}
 0xa20   : > { %s3246_s23 = smov 128   ;;  %s3247_s9 = smov 8  }
 0xa21   : > { %2792 = dma.vmem_to_hbm [thread:$0]  (%p3418_p5), %s4115_s10, 896, %s4113_s25, %s2263_s19, %s3246_s23, %s3246_s23, %s3247_s9  }
 0xa22 PF: > { %s2291_s5 = sand.u32 1, %s3222_s15   ;;  %p4184_p12 = scmp.ne.s32.totalorder %s4170_s22, 0 }
 0xa23   : > { %p4185_p2 = scmp.ge.s32.totalorder %s3234_s18, 2  ;;  %s2292_s7 = scalar_lea.sflag [#allocation4], %s2291_s5 }
 0xa25   : > { %p2809_p1 = pnand %p4185_p2, %p4184_p12 }
 0xa27   : > { %3217 = dma.done.wait (!%p2809_p1), %s2292_s7, 896  }
 0xa28   : > { %3219 = vsyncadd (!%p2809_p1), %s2292_s7, 4294966400  ;;  %p19_p4 = scmp.ge.s32.totalorder %s3386_s20, 4   ;;  %s4186_s15 = smov %s3226_s16 }
 0xa29   : > { %s4187_s16 = smov %s3230_s17  ;;  %s4188_s17 = smov %s3414_s26 }
 0xa2a   : > { %s4189_s18 = smov %s3386_s20  ;;  %21 = sbr.rel (!%p19_p4) target bundleno = 7 (0x7), region = 93 }
 0xa31   :  { %2297 = vsyncpa [#allocation3], 1 }
 0xa32   :  { %2299 = vsyncpa [#allocation3 + $0x1], 1 }
 0xa33   :  { %2300 = vsyncpa [#allocation6], 1 }
 0xa34   :  { %2301 = vsyncpa [#allocation9], 1 }
 0xa35   :  { %2302 = vsyncpa [#allocation4], 1 }
 0xa36   :  { %2304 = vsyncpa [#allocation4 + $0x1], 1 }

</bundles_post_ra>
